<compile_context>
chip_gen: v7x
topology: tpu7x:2x2x1
jax: 0.10.0
libtpu: 0.0.40
codegen_flags: <defaults>
</compile_context>

<pallas_src>
import jax
import jax.numpy as jnp
from jax.experimental import pallas as pl
from jax.experimental.pallas import tpu as pltpu

IN_FEATURES = 28 * 28   # 784
HIDDEN = 512
OUT_FEATURES = 10
N_PAD = 128             # lane-dense MXU N-width for layer 2 (compute only)


def _round_up(x, m):
    return ((x + m - 1) // m) * m


def _choose_tm(B, tm_max):
    """Pick a batch tile (multiple of 16) minimizing padding + per-step overhead."""
    if B <= 32:
        cap = _round_up(B, 16)
    else:
        # >= 2 tiles so v7x's two TensorCores both get work on small/moderate B.
        cap = _round_up(-(-B // 2), 16)
    cap = max(16, min(tm_max, cap))
    best_t, best_cost = 16, None
    for t in range(16, cap + 1, 16):
        b_pad = _round_up(B, t)
        steps = b_pad // t
        # cost in "row equivalents": padded rows processed + ~0.35us/step overhead
        cost = b_pad + 128 * steps
        if best_cost is None or cost < best_cost:
            best_t, best_cost = t, cost
    return best_t


def mlp_kernel(x_ref, w1_ref, b1_ref, w2_ref, b2_ref, o_ref):
    # x_ref:  [TM, 784]  f32       w1_ref: [784, 512] bf16   b1_ref: [1, 512]  f32
    # w2_ref: [512, 128] bf16      b2_ref: [1, 128]   f32    o_ref:  [TM, 10]  f32
    x = x_ref[...].astype(jnp.bfloat16)                       # cast in VMEM (VPU)
    h = jnp.dot(x, w1_ref[...], preferred_element_type=jnp.float32) + b1_ref[...]
    h = jnp.maximum(h, 0.0)                                   # ReLU on VPU
    logits = jnp.dot(h.astype(jnp.bfloat16), w2_ref[...],
                     preferred_element_type=jnp.float32) + b2_ref[...]
    o_ref[...] = logits[:, :OUT_FEATURES]                     # write only useful lanes


def prepare_params(w1, b1, w2, b2):
    """One-time weight prep (call at parameter-load time, not per forward)."""
    w1_bf = w1.astype(jnp.bfloat16)
    b1_2d = b1.reshape(1, HIDDEN).astype(jnp.float32)
    w2_pad = jnp.zeros((HIDDEN, N_PAD), jnp.bfloat16).at[:, :OUT_FEATURES].set(
        w2.astype(jnp.bfloat16))
    b2_pad = jnp.zeros((1, N_PAD), jnp.float32).at[:, :OUT_FEATURES].set(
        b2.astype(jnp.float32))
    return w1_bf, b1_2d, w2_pad, b2_pad


def neural_network_forward(x_nchw, prepared, *, tm=512, force_pallas=False):
    """Forward pass matching the PyTorch module.

    x_nchw: [B, 1, 28, 28] float32 (NCHW, as PyTorch would feed it)
    prepared: output of prepare_params(w1, b1, w2, b2)
    returns: [B, 10] float32 logits
    """
    w1_bf, b1_2d, w2_pad, b2_pad = prepared
    B = x_nchw.shape[0]
    # nn.Flatten(): flatten all dims except batch (row-major, matches torch)
    x = x_nchw.reshape(B, -1).astype(jnp.float32)
    assert x.shape[1] == IN_FEATURES

    if not force_pallas and B <= 64:
        # Small-batch fallback: pure XLA avoids fixed Pallas launch latency.
        h = jnp.maximum(
            jnp.dot(x.astype(jnp.bfloat16), w1_bf,
                    preferred_element_type=jnp.float32) + b1_2d, 0.0)
        logits = jnp.dot(h.astype(jnp.bfloat16), w2_pad,
                         preferred_element_type=jnp.float32) + b2_pad
        return logits[:, :OUT_FEATURES]

    TM = _choose_tm(B, tm)
    B_pad = _round_up(B, TM)
    if B_pad != B:
        x = jnp.pad(x, ((0, B_pad - B), (0, 0)))

    grid = (B_pad // TM,)
    cost = pl.CostEstimate(
        flops=2 * B_pad * (IN_FEATURES * HIDDEN + HIDDEN * N_PAD),
        transcendentals=0,
        bytes_accessed=(B_pad * IN_FEATURES * 4            # x (f32)
                        + IN_FEATURES * HIDDEN * 2         # w1 (bf16)
                        + HIDDEN * N_PAD * 2               # w2 (bf16)
                        + HIDDEN * 4 + N_PAD * 4           # biases (f32)
                        + B_pad * OUT_FEATURES * 4),       # out (f32)
    )

    out = pl.pallas_call(
        mlp_kernel,
        out_shape=jax.ShapeDtypeStruct((B_pad, OUT_FEATURES), jnp.float32),
        grid=grid,
        in_specs=[
            # x tile marches over the batch; weights/biases stay VMEM-resident.
            pl.BlockSpec((TM, IN_FEATURES), lambda i: (i, 0)),
            pl.BlockSpec((IN_FEATURES, HIDDEN), lambda i: (0, 0)),
            pl.BlockSpec((1, HIDDEN), lambda i: (0, 0)),
            pl.BlockSpec((HIDDEN, N_PAD), lambda i: (0, 0)),
            pl.BlockSpec((1, N_PAD), lambda i: (0, 0)),
        ],
        out_specs=pl.BlockSpec((TM, OUT_FEATURES), lambda i: (i, 0)),
        compiler_params=pltpu.CompilerParams(
            dimension_semantics=("parallel",)),
        cost_estimate=cost,
    )(x, w1_bf, b1_2d, w2_pad, b2_pad)

    return out[:B] if B_pad != B else out


def init_params(key):
    """Deterministic init mirroring nn.Linear default (uniform +/- 1/sqrt(fan_in))."""
    k1, k2, k3, k4 = jax.random.split(key, 4)
    bound1 = 1.0 / jnp.sqrt(IN_FEATURES)
    bound2 = 1.0 / jnp.sqrt(HIDDEN)
    w1 = jax.random.uniform(k1, (IN_FEATURES, HIDDEN), jnp.float32, -bound1, bound1)
    b1 = jax.random.uniform(k2, (HIDDEN,), jnp.float32, -bound1, bound1)
    w2 = jax.random.uniform(k3, (HIDDEN, OUT_FEATURES), jnp.float32, -bound2, bound2)
    b2 = jax.random.uniform(k4, (OUT_FEATURES,), jnp.float32, -bound2, bound2)
    return w1, b1, w2, b2


if __name__ == "__main__":
    key = jax.random.PRNGKey(0)
    k_x, k_p = jax.random.split(key)

    # Big enough batch to exercise the Pallas path with >= 2 grid tiles.
    B = 128
    x = jax.random.normal(k_x, (B, 1, 28, 28), dtype=jnp.float32)
    w1, b1, w2, b2 = init_params(k_p)

    prepared = prepare_params(w1, b1, w2, b2)
    prepared = jax.block_until_ready(prepared)   # one-time weight prep

    fwd = jax.jit(neural_network_forward)
    logits = fwd(x, prepared)
    jax.block_until_ready(logits)
    assert logits.shape == (B, OUT_FEATURES)

    # Reference with the same bf16 casting (tight check on kernel math).
    x_flat = x.reshape(B, -1)
    h_ref = jnp.maximum(
        jnp.dot(x_flat.astype(jnp.bfloat16), w1.astype(jnp.bfloat16),
                preferred_element_type=jnp.float32) + b1, 0.0)
    ref_bf = jnp.dot(h_ref.astype(jnp.bfloat16), w2.astype(jnp.bfloat16),
                     preferred_element_type=jnp.float32) + b2
    assert jnp.allclose(logits, ref_bf, atol=2e-2, rtol=2e-2), "mismatch vs bf16 reference"

    # Loose sanity check vs pure-f32 math (bf16 quantization error only).
    ref_f32 = jnp.maximum(x_flat @ w1 + b1, 0.0) @ w2 + b2
    assert jnp.allclose(logits, ref_f32, atol=1e-1, rtol=1e-1), "mismatch vs f32 reference"

    # Small-batch fallback path (plain XLA) should agree too.
    logits_small = neural_network_forward(x[:8], prepared)
    jax.block_until_ready(logits_small)
    assert logits_small.shape == (8, OUT_FEATURES)
    assert jnp.allclose(logits_small, ref_bf[:8], atol=2e-2, rtol=2e-2), "fallback mismatch"

    print("KERNEL_OK")
</pallas_src>

<mosaic_0001>
module attributes {stable_mosaic.version = 11 : i64} {
  func.func @mlp_kernel(%arg0: i32, %arg1: memref<64x784xf32, #tpu.memory_space<vmem>>, %arg2: memref<784x512xbf16, #tpu.memory_space<vmem>>, %arg3: memref<1x512xf32, #tpu.memory_space<vmem>>, %arg4: memref<512x128xbf16, #tpu.memory_space<vmem>>, %arg5: memref<1x128xf32, #tpu.memory_space<vmem>>, %arg6: memref<64x10xf32, #tpu.memory_space<vmem>>) attributes {dimension_semantics = [#tpu.dimension_semantics<parallel>], iteration_bounds = array<i64: 2>, scalar_prefetch = 0 : i64, scratch_operands = 0 : i64, tpu.core_type = #tpu.core_type<tc>, window_params = [{transform_indices = @transform_0, window_bounds = array<i64: 64, 784>}, {pipeline_mode = #tpu.pipeline_mode<synchronous>, transform_indices = @transform_1, window_bounds = array<i64: 784, 512>}, {pipeline_mode = #tpu.pipeline_mode<synchronous>, transform_indices = @transform_2, window_bounds = array<i64: 1, 512>}, {pipeline_mode = #tpu.pipeline_mode<synchronous>, transform_indices = @transform_3, window_bounds = array<i64: 512, 128>}, {pipeline_mode = #tpu.pipeline_mode<synchronous>, transform_indices = @transform_4, window_bounds = array<i64: 1, 128>}, {transform_indices = @transform_5, window_bounds = array<i64: 64, 10>}]} {
    %c0 = arith.constant 0 : index
    %c0_0 = arith.constant 0 : index
    %0 = vector.load %arg1[%c0, %c0_0] : memref<64x784xf32, #tpu.memory_space<vmem>>, vector<64x784xf32>
    %1 = arith.truncf %0 : vector<64x784xf32> to vector<64x784xbf16>
    %c0_1 = arith.constant 0 : index
    %c0_2 = arith.constant 0 : index
    %2 = vector.load %arg2[%c0_1, %c0_2] : memref<784x512xbf16, #tpu.memory_space<vmem>>, vector<784x512xbf16>
    %cst = arith.constant dense<0.000000e+00> : vector<64x512xf32>
    %3 = tpu.matmul %1, %2, %cst {dimension_numbers = #tpu.dot_dimension_numbers<[1], [0], [0], [1], [0, 0, 1, 1], [], []>} : vector<64x784xbf16>, vector<784x512xbf16>, vector<64x512xf32> -> vector<64x512xf32>
    %c0_3 = arith.constant 0 : index
    %c0_4 = arith.constant 0 : index
    %4 = vector.load %arg3[%c0_3, %c0_4] : memref<1x512xf32, #tpu.memory_space<vmem>>, vector<1x512xf32>
    %5 = vector.broadcast %4 : vector<1x512xf32> to vector<64x512xf32>
    %6 = arith.addf %3, %5 : vector<64x512xf32>
    %cst_5 = arith.constant 0.000000e+00 : f32
    %7 = vector.broadcast %cst_5 : f32 to vector<64x512xf32>
    %8 = arith.maximumf %6, %7 : vector<64x512xf32>
    %9 = arith.truncf %8 : vector<64x512xf32> to vector<64x512xbf16>
    %c0_6 = arith.constant 0 : index
    %c0_7 = arith.constant 0 : index
    %10 = vector.load %arg4[%c0_6, %c0_7] : memref<512x128xbf16, #tpu.memory_space<vmem>>, vector<512x128xbf16>
    %cst_8 = arith.constant dense<0.000000e+00> : vector<64x128xf32>
    %11 = tpu.matmul %9, %10, %cst_8 {dimension_numbers = #tpu.dot_dimension_numbers<[1], [0], [0], [1], [0, 0, 1, 1], [], []>} : vector<64x512xbf16>, vector<512x128xbf16>, vector<64x128xf32> -> vector<64x128xf32>
    %c0_9 = arith.constant 0 : index
    %c0_10 = arith.constant 0 : index
    %12 = vector.load %arg5[%c0_9, %c0_10] : memref<1x128xf32, #tpu.memory_space<vmem>>, vector<1x128xf32>
    %13 = vector.broadcast %12 : vector<1x128xf32> to vector<64x128xf32>
    %14 = arith.addf %11, %13 : vector<64x128xf32>
    %15 = vector.extract_strided_slice %14 {offsets = [0, 0], sizes = [64, 10], strides = [1, 1]} : vector<64x128xf32> to vector<64x10xf32>
    %c0_11 = arith.constant 0 : index
    %c0_12 = arith.constant 0 : index
    %16 = vector.load %arg6[%c0_11, %c0_12] : memref<64x10xf32, #tpu.memory_space<vmem>>, vector<64x10xf32>
    tpu.vector_store %arg6[%c0_11, %c0_12], %15 {strides = array<i32>} : memref<64x10xf32, #tpu.memory_space<vmem>>, vector<64x10xf32>,
    return
  }
  func.func @transform_0(%arg0: i32) -> (i32, i32) {
    %c0_i32 = arith.constant 0 : i32
    %c0_i32_0 = arith.constant 0 : i32
    return %arg0, %c0_i32 : i32, i32
  }
  func.func @transform_1(%arg0: i32) -> (i32, i32) {
    %c0_i32 = arith.constant 0 : i32
    %c0_i32_0 = arith.constant 0 : i32
    %c0_i32_1 = arith.constant 0 : i32
    return %c0_i32, %c0_i32_0 : i32, i32
  }
  func.func @transform_2(%arg0: i32) -> (i32, i32) {
    %c0_i32 = arith.constant 0 : i32
    %c0_i32_0 = arith.constant 0 : i32
    %c0_i32_1 = arith.constant 0 : i32
    return %c0_i32, %c0_i32_0 : i32, i32
  }
  func.func @transform_3(%arg0: i32) -> (i32, i32) {
    %c0_i32 = arith.constant 0 : i32
    %c0_i32_0 = arith.constant 0 : i32
    %c0_i32_1 = arith.constant 0 : i32
    return %c0_i32, %c0_i32_0 : i32, i32
  }
  func.func @transform_4(%arg0: i32) -> (i32, i32) {
    %c0_i32 = arith.constant 0 : i32
    %c0_i32_0 = arith.constant 0 : i32
    %c0_i32_1 = arith.constant 0 : i32
    return %c0_i32, %c0_i32_0 : i32, i32
  }
  func.func @transform_5(%arg0: i32) -> (i32, i32) {
    %c0_i32 = arith.constant 0 : i32
    %c0_i32_0 = arith.constant 0 : i32
    return %arg0, %c0_i32 : i32, i32
  }
}

</mosaic_0001>

<bundles_post_ra>
// kernel: neural_network_forward.1
= control target key start
LH: loop header
LB: loop body
LE: loop exit
PB: predicated region body
PF: predicated region fallthrough
CT: control target
= control target key end

     0   :  { %10 = vsyncpa [#allocation3], 0  ;;  %s3525_s18 = smov 0   ;;  %s4316_s0 = inlined_call_operand.vmem [shape: f32[128,784], index: 0, kind: input, shape index: {}]   ;;  %s4317_s1 = inlined_call_operand.vmem [shape: bf16[784,512], index: 1, kind: input, shape index: {}]   ;;  %s4318_s2 = inlined_call_operand.vmem [shape: f32[1,512], index: 2, kind: input, shape index: {}]   ;;  %s4319_s3 = inlined_call_operand.hbm [shape: bf16[512,128], index: 3, kind: input, shape index: {}]   ;;  %s4320_s4 = inlined_call_operand.vmem [shape: f32[1,128], index: 4, kind: input, shape index: {}]   ;;  %s4321_s5 = inlined_call_operand.vmem [shape: f32[128,10], index: 5, kind: output, shape index: {}]  }
   0x1 LB: > { %s2644_s19 = sadd.s32 4294967295, %s3489_s18   ;;  %p2646_p0 = scmp.ge.s32.totalorder %s3489_s18, 1  ;;  %s3489_s18 = sphi %s3525_s18, %s16_s18  }
   0x2   : > { %p157_p1 = scmp.lt.s32.totalorder %s3489_s18, 3  ;;  %s3491_s20 = smov [#allocation2]  }
   0x3   : > { %s175_s21 = sshll.u32 %s3491_s20, 4  ;;  %p3539_p3 = scmp.eq.s32.totalorder %s2644_s19, 0  ;;  %s176_s21 = int_to_ptr.vmem [resolvable:$true] %s175_s21 }
   0x4   : > { %p3533_p2 = pnand %p2646_p0, %p157_p1  ;;  %s3451_s27 = scalar_lea.hbm %s4319_s3, 4096 }
   0x5   : > { %s4326_s23 = scalar_select %p3539_p3, 1, 0 }
   0x6   : > { %s4325_s22 = scalar_select %p3533_p2, 1, 0 }
   0x7   : > { %p3107_p4 = pneg %p3533_p2  ;;  %p3452_p6 = scmp.ne.s32.totalorder %s4319_s3, %s3451_s27 }
   0x8   : > { %p3458_p10 = scmp.lt.u32.totalorder %s3451_s27, %s4319_s3 }
   0x9   : > { %p3547_p5 = pnand %p3539_p3, %p3107_p4 }
   0xb   : > { %p3453_p7 = pneg %p3547_p5 }
   0xd   : > { %p3454_p8 = pnand %p3453_p7, %p3452_p6 }
   0xf   : > { %p3455_p9 = pneg %p3454_p8 }
  0x11   : > { %p3460_p11 = pnand %p3458_p10, %p3455_p9 }
  0x13   : > { %3463 = shalt.err (!%p3460_p11)
}
  0x14   : > { %s3464_s7 = scalar_lea.vmem %s176_s21, 4096  ;;  %p3472_p1 = scmp.lt.s32.totalorder %s176_s21, %s176_s21 }
  0x15   : > { %p3465_p12 = scmp.ne.s32.totalorder %s176_s21, %s3464_s7  ;;  %p3473_p4 = scmp.lt.s32.totalorder %s3464_s7, %s3464_s7 }
  0x17   : > { %p3467_p13 = pnand %p3465_p12, %p3453_p7  ;;  %p3474_p3 = por %p3473_p4, %p3472_p1 }
  0x19   : > { %p3468_p0 = pneg %p3467_p13 }
  0x1b   : > { %p3475_p2 = pnand %p3474_p3, %p3468_p0 }
  0x1d   : > { %3478 = shalt.err (!%p3475_p2)
}
  0x1e   : > { %s3492_s8 = smov 64   ;;  %s3493_s9 = smov 4  }
  0x1f   : > { %3110 = dma.hbm_to_vmem [thread:$0]  (!%p3547_p5), %s4319_s3, 4096, %s176_s21, [#allocation3], %s3492_s8, %s3492_s8, %s3493_s9  }
  0x20   : > { %p4328_p6 = scmp.ne.s32.totalorder %s4325_s22, 0 }
  0x21   : > { %p4329_p8 = scmp.ne.s32.totalorder (!%p4328_p6), %s4326_s23, 0 }
  0x22   : > { %204 = sbr.rel (%p4328_p6) target bundleno = 735 (0x2df), region = 40 }
  0x29   : > { %3484 = dma.done.wait (%p4329_p8), [#allocation3], 4096  }
  0x2a   : > { %3486 = vsyncadd (%p4329_p8), [#allocation3], 4294963200  ;;  %v3125_v0 = vld [vmem:[%s4317_s1 + $0x4] ss:$16 sps:$4 sm:$0xff]   ;;  %v3127_v1 = vld [vmem:[%s4317_s1 + $0xc] ss:$16 sps:$4 sm:$0xff]  }
  0x2b   : > { %1542 = vmatprep.subr.bf16.mxu0 %v3125_v0  ;;  %v3129_v2 = vld [vmem:[%s4317_s1] ss:$16 sps:$4 sm:$0xff]   ;;  %v3130_v3 = vld [vmem:[%s4317_s1 + $0x8] ss:$16 sps:$4 sm:$0xff]   ;;  %1834 = vmatprep.subr.bf16.mxu1 %v3127_v1  ;;  %v3131_v4 = vld [vmem:[%s4317_s1 + $0x24] ss:$16 sps:$4 sm:$0xff]  }
  0x2c   : > { %1543 = vmatpush1.bf16.msra.mxu0 %v3129_v2  ;;  %1835 = vmatpush1.bf16.msra.mxu1 %v3130_v3  ;;  %v3133_v5 = vld [vmem:[%s4317_s1 + $0x2c] ss:$16 sps:$4 sm:$0xff]   ;;  %v3135_v6 = vld [vmem:[%s4317_s1 + $0x20] ss:$16 sps:$4 sm:$0xff]   ;;  %v3136_v7 = vld [vmem:[%s4317_s1 + $0x28] ss:$16 sps:$4 sm:$0xff]  }
  0x2d   : > { %1544 = vmatprep.subr.bf16.mxu0 %v3131_v4  ;;  %1836 = vmatprep.subr.bf16.mxu1 %v3133_v5  ;;  %v3137_v8 = vld [vmem:[%s4317_s1 + $0x44] ss:$16 sps:$4 sm:$0xff]   ;;  %v3139_v9 = vld [vmem:[%s4317_s1 + $0x4c] ss:$16 sps:$4 sm:$0xff]   ;;  %v3141_v10 = vld [vmem:[%s4317_s1 + $0x40] ss:$16 sps:$4 sm:$0xff]  }
  0x2e   : > { %v3142_v11 = vld [vmem:[%s4317_s1 + $0x48] ss:$16 sps:$4 sm:$0xff]   ;;  %v3143_v12 = vld [vmem:[%s4317_s1 + $0x64] ss:$16 sps:$4 sm:$0xff]   ;;  %v3145_v13 = vld [vmem:[%s4317_s1 + $0x6c] ss:$16 sps:$4 sm:$0xff]  }
  0x2f   : > { %v3147_v14 = vld [vmem:[%s4317_s1 + $0x60] ss:$16 sps:$4 sm:$0xff]   ;;  %v3148_v15 = vld [vmem:[%s4317_s1 + $0x68] ss:$16 sps:$4 sm:$0xff]   ;;  %v3149_v16 = vld [vmem:[%s4317_s1 + $0x84] ss:$16 sps:$4 sm:$0xff]  }
  0x30   : > { %1545 = vmatpush1.bf16.msra.mxu0 %v3135_v6  ;;  %1837 = vmatpush1.bf16.msra.mxu1 %v3136_v7  ;;  %v3151_v17 = vld [vmem:[%s4317_s1 + $0x8c] ss:$16 sps:$4 sm:$0xff]   ;;  %v3153_v18 = vld [vmem:[%s4317_s1 + $0x80] ss:$16 sps:$4 sm:$0xff]   ;;  %v3154_v19 = vld [vmem:[%s4317_s1 + $0x88] ss:$16 sps:$4 sm:$0xff]  }
  0x31   : > { %1546 = vmatprep.subr.bf16.mxu0 %v3137_v8  ;;  %1838 = vmatprep.subr.bf16.mxu1 %v3139_v9  ;;  %v3155_v20 = vld [vmem:[%s4317_s1 + $0xa4] ss:$16 sps:$4 sm:$0xff]   ;;  %v3157_v21 = vld [vmem:[%s4317_s1 + $0xac] ss:$16 sps:$4 sm:$0xff]   ;;  %v3159_v22 = vld [vmem:[%s4317_s1 + $0xa0] ss:$16 sps:$4 sm:$0xff]  }
  0x32   : > { %v3160_v23 = vld [vmem:[%s4317_s1 + $0xa8] ss:$16 sps:$4 sm:$0xff]   ;;  %v3161_v24 = vld [vmem:[%s4317_s1 + $0xc4] ss:$16 sps:$4 sm:$0xff]   ;;  %v3163_v25 = vld [vmem:[%s4317_s1 + $0xcc] ss:$16 sps:$4 sm:$0xff]  }
  0x33   : > { %v3165_v26 = vld [vmem:[%s4317_s1 + $0xc0] ss:$16 sps:$4 sm:$0xff]   ;;  %v3166_v27 = vld [vmem:[%s4317_s1 + $0xc8] ss:$16 sps:$4 sm:$0xff]   ;;  %v3167_v28 = vld [vmem:[%s4317_s1 + $0xe4] ss:$16 sps:$4 sm:$0xff]  }
  0x34   : > { %1547 = vmatpush1.bf16.msra.mxu0 %v3141_v10  ;;  %1839 = vmatpush1.bf16.msra.mxu1 %v3142_v11  ;;  %s2651_s26 = sshll.u32 %s2644_s19, 3  ;;  %v3169_v29 = vld [vmem:[%s4317_s1 + $0xec] ss:$16 sps:$4 sm:$0xff]   ;;  %v3171_v30 = vld [vmem:[%s4317_s1 + $0xe0] ss:$16 sps:$4 sm:$0xff]   ;;  %vm1529_vm0 = vcmask 130048  }
  0x35   : > { %1548 = vmatprep.subr.bf16.mxu0 %v3143_v12  ;;  %1840 = vmatprep.subr.bf16.mxu1 %v3145_v13  ;;  %p234_p2 = scmp.lt.s32.totalorder %s2651_s26, 15  ;;  %v3172_v31 = vld [vmem:[%s4317_s1 + $0xe8] ss:$16 sps:$4 sm:$0xff]   ;;  %v3173_v32 = vld [vmem:[%s4317_s1 + $0x104] ss:$16 sps:$4 sm:$0xff]   ;;  %vm2567_vm1 = vcmask 80896  }
  0x36   : > { %v3175_v33 = vld [vmem:[%s4317_s1 + $0x10c] ss:$16 sps:$4 sm:$0xff]   ;;  %v3177_v34 = vld [vmem:[%s4317_s1 + $0x100] ss:$16 sps:$4 sm:$0xff]   ;;  %v3178_v35 = vld [vmem:[%s4317_s1 + $0x108] ss:$16 sps:$4 sm:$0xff]  }
  0x37   : > { %s4331_s26 = smov (!%p234_p2, %s2651_s26), 15  ;;  %v3179_v36 = vld [vmem:[%s4317_s1 + $0x124] ss:$16 sps:$4 sm:$0xff]   ;;  %v3181_v37 = vld [vmem:[%s4317_s1 + $0x12c] ss:$16 sps:$4 sm:$0xff]  }
  0x38   : > { %1549 = vmatpush1.bf16.msra.mxu0 %v3147_v14  ;;  %1841 = vmatpush1.bf16.msra.mxu1 %v3148_v15  ;;  %v3183_v38 = vld [vmem:[%s4317_s1 + $0x120] ss:$16 sps:$4 sm:$0xff]   ;;  %s3102_s23 = smul.u32 56, %s4331_s26  ;;  %v3184_v39 = vld [vmem:[%s4317_s1 + $0x128] ss:$16 sps:$4 sm:$0xff]   ;;  %s2654_s10 = sshll.u32 %s4331_s26, 3 }
  0x39   : > { %1550 = vmatprep.subr.bf16.mxu0 %v3149_v16  ;;  %1842 = vmatprep.subr.bf16.mxu1 %v3151_v17  ;;  %v3185_v40 = vld [vmem:[%s4317_s1 + $0x144] ss:$16 sps:$4 sm:$0xff]   ;;  %v3187_v41 = vld [vmem:[%s4317_s1 + $0x14c] ss:$16 sps:$4 sm:$0xff]   ;;  %v3189_v42 = vld [vmem:[%s4317_s1 + $0x140] ss:$16 sps:$4 sm:$0xff]   ;;  %s4288_s14 = scalar_lea.vmem %s4321_s5, %s2654_s10 }
  0x3a   : > { %v3190_v43 = vld [vmem:[%s4317_s1 + $0x148] ss:$16 sps:$4 sm:$0xff]   ;;  %s3713_s11 = scalar_lea.vmem %s4316_s0, %s3102_s23  ;;  %v3191_v44 = vld [vmem:[%s4317_s1 + $0x164] ss:$16 sps:$4 sm:$0xff]   ;;  %v3193_v45 = vld [vmem:[%s4317_s1 + $0x16c] ss:$16 sps:$4 sm:$0xff]  }
  0x3b   : > { %v248_v46 = vld [vmem:[%s3713_s11 + $0x8] sm:$0xff]  ;;  %v255_v47 = vld [vmem:[%s3713_s11 + $0x40] sm:$0xff]  ;;  %v254_v5 = vld [vmem:[%s3713_s11 + $0x38] sm:$0xff] }
  0x3c   : > { %1551 = vmatpush1.bf16.msra.mxu0 %v3153_v18  ;;  %1843 = vmatpush1.bf16.msra.mxu1 %v3154_v19  ;;  %v3195_v48 = vld [vmem:[%s4317_s1 + $0x160] ss:$16 sps:$4 sm:$0xff]   ;;  %v3196_v49 = vld [vmem:[%s4317_s1 + $0x168] ss:$16 sps:$4 sm:$0xff]   ;;  %v304_v50 = vpack.c.bf16 %v255_v47, %v248_v46  ;;  %v3197_v51 = vld [vmem:[%s4317_s1 + $0x184] ss:$16 sps:$4 sm:$0xff]  }
  0x3d   : > { %1552 = vmatprep.subr.bf16.mxu0 %v3155_v20  ;;  %1844 = vmatprep.subr.bf16.mxu1 %v3157_v21  ;;  %v3199_v52 = vld [vmem:[%s4317_s1 + $0x18c] ss:$16 sps:$4 sm:$0xff]   ;;  %v3201_v53 = vld [vmem:[%s4317_s1 + $0x180] ss:$16 sps:$4 sm:$0xff]   ;;  %v3202_v54 = vld [vmem:[%s4317_s1 + $0x188] ss:$16 sps:$4 sm:$0xff]  }
  0x3e   : > { %1574 = vmatprep.mubr.bf16.mxu0 %v304_v50  ;;  %1866 = vmatprep.mubr.bf16.mxu1 %v304_v50  ;;  %v3203_v55 = vld [vmem:[%s4317_s1 + $0x1a4] ss:$16 sps:$4 sm:$0xff]   ;;  %v3205_v56 = vld [vmem:[%s4317_s1 + $0x1ac] ss:$16 sps:$4 sm:$0xff]   ;;  %v3207_v57 = vld [vmem:[%s4317_s1 + $0x1a0] ss:$16 sps:$4 sm:$0xff]  }
  0x3f   : > { %v3208_v58 = vld [vmem:[%s4317_s1 + $0x1a8] ss:$16 sps:$4 sm:$0xff]   ;;  %v3209_v59 = vld [vmem:[%s4317_s1 + $0x1c4] ss:$16 sps:$4 sm:$0xff]   ;;  %v3211_v60 = vld [vmem:[%s4317_s1 + $0x1cc] ss:$16 sps:$4 sm:$0xff]  }
  0x40   : > { %1553 = vmatpush1.bf16.msra.mxu0 %v3159_v22  ;;  %1845 = vmatpush1.bf16.msra.mxu1 %v3160_v23  ;;  %v3213_v61 = vld [vmem:[%s4317_s1 + $0x1c0] ss:$16 sps:$4 sm:$0xff]   ;;  %v3214_v62 = vld [vmem:[%s4317_s1 + $0x1c8] ss:$16 sps:$4 sm:$0xff]   ;;  %v3215_v63 = vld [vmem:[%s4317_s1 + $0x1e4] ss:$16 sps:$4 sm:$0xff]  }
  0x41   : > { %1554 = vmatprep.subr.bf16.mxu0 %v3161_v24  ;;  %1846 = vmatprep.subr.bf16.mxu1 %v3163_v25  ;;  %v3217_v0 = vld [vmem:[%s4317_s1 + $0x1ec] ss:$16 sps:$4 sm:$0xff]   ;;  %v3219_v1 = vld [vmem:[%s4317_s1 + $0x1e0] ss:$16 sps:$4 sm:$0xff]   ;;  %v3220_v2 = vld [vmem:[%s4317_s1 + $0x1e8] ss:$16 sps:$4 sm:$0xff]  }
  0x42   : > { %v3223_v3 = vld [vmem:[%s4317_s1 + $0x204] ss:$16 sps:$4 sm:$0xff]   ;;  %v3226_v6 = vld [vmem:[%s4317_s1 + $0x20c] ss:$16 sps:$4 sm:$0xff]   ;;  %v3221_v7 = vld [vmem:[%s4317_s1 + $0x200] ss:$16 sps:$4 sm:$0xff]  }
  0x43   : > { %v247_v4 = vld [vmem:[%s3713_s11] sm:$0xff]  ;;  %v3224_v8 = vld [vmem:[%s4317_s1 + $0x208] ss:$16 sps:$4 sm:$0xff]   ;;  %v3232_v11 = vld [vmem:[%s4317_s1 + $0x22c] ss:$16 sps:$4 sm:$0xff]  }
  0x44   : > { %1555 = vmatpush1.bf16.msra.mxu0 %v3165_v26  ;;  %1847 = vmatpush1.bf16.msra.mxu1 %v3166_v27  ;;  %v303_v9 = vpack.c.bf16 %v254_v5, %v247_v4  ;;  %v3229_v10 = vld [vmem:[%s4317_s1 + $0x224] ss:$16 sps:$4 sm:$0xff]   ;;  %v3227_v12 = vld [vmem:[%s4317_s1 + $0x220] ss:$16 sps:$4 sm:$0xff]   ;;  %v3230_v13 = vld [vmem:[%s4317_s1 + $0x228] ss:$16 sps:$4 sm:$0xff]  }
  0x45   : > { %1556 = vmatprep.subr.bf16.mxu0 %v3167_v28  ;;  %1848 = vmatprep.subr.bf16.mxu1 %v3169_v29  ;;  %v3235_v14 = vld [vmem:[%s4317_s1 + $0x244] ss:$16 sps:$4 sm:$0xff]   ;;  %v3238_v15 = vld [vmem:[%s4317_s1 + $0x24c] ss:$16 sps:$4 sm:$0xff]   ;;  %v3233_v18 = vld [vmem:[%s4317_s1 + $0x240] ss:$16 sps:$4 sm:$0xff]  }
  0x46   : > { %v262_v16 = vld [vmem:[%s3713_s11 + $0x78] sm:$0xff]  ;;  %v269_v17 = vld [vmem:[%s3713_s11 + $0xb0] sm:$0xff]  ;;  %v268_v24 = vld [vmem:[%s3713_s11 + $0xa8] sm:$0xff] }
  0x47   : > { %v3236_v19 = vld [vmem:[%s4317_s1 + $0x248] ss:$16 sps:$4 sm:$0xff]   ;;  %v311_v20 = vpack.c.bf16 %v269_v17, %v262_v16  ;;  %v3241_v21 = vld [vmem:[%s4317_s1 + $0x264] ss:$16 sps:$4 sm:$0xff]   ;;  %v3244_v22 = vld [vmem:[%s4317_s1 + $0x26c] ss:$16 sps:$4 sm:$0xff]  }
  0x48   : > { %1557 = vmatpush1.bf16.msra.mxu0 %v3171_v30  ;;  %1849 = vmatpush1.bf16.msra.mxu1 %v3172_v31  ;;  %v261_v23 = vld [vmem:[%s3713_s11 + $0x70] sm:$0xff]  ;;  %v3242_v26 = vld [vmem:[%s4317_s1 + $0x268] ss:$16 sps:$4 sm:$0xff]   ;;  %v3250_v29 = vld [vmem:[%s4317_s1 + $0x28c] ss:$16 sps:$4 sm:$0xff]  }
  0x49   : > { %1558 = vmatprep.subr.bf16.mxu0 %v3173_v32  ;;  %1850 = vmatprep.subr.bf16.mxu1 %v3175_v33  ;;  %v3239_v25 = vld [vmem:[%s4317_s1 + $0x260] ss:$16 sps:$4 sm:$0xff]   ;;  %v310_v27 = vpack.c.bf16 %v268_v24, %v261_v23  ;;  %v3247_v28 = vld [vmem:[%s4317_s1 + $0x284] ss:$16 sps:$4 sm:$0xff]   ;;  %v276_v30 = vld [vmem:[%s3713_s11 + $0xe8] sm:$0xff] }
  0x4a   : > { %v283_v31 = vld [vmem:[%s3713_s11 + $0x120] sm:$0xff]  ;;  %v296_v50 = vld [vmem:[%s3713_s11 + $0x188] sm:$0xff] }
  0x4b   : > { %v3245_v32 = vld [vmem:[%s4317_s1 + $0x280] ss:$16 sps:$4 sm:$0xff]   ;;  %v318_v33 = vpack.c.bf16 %v283_v31, %v276_v30  ;;  %v3286_v4 = vld [vmem:[%s4317_s1 + $0x34c] ss:$16 sps:$4 sm:$0xff]   ;;  %v3313_v23 = vld [vmem:[%s4317_s1 + $0x3e4] ss:$16 sps:$4 sm:$0xff]  }
  0x4c   : > { %1559 = vmatpush1.bf16.msra.mxu0 %v3177_v34  ;;  %1851 = vmatpush1.bf16.msra.mxu1 %v3178_v35  ;;  %v3248_v34 = vld [vmem:[%s4317_s1 + $0x288] ss:$16 sps:$4 sm:$0xff]   ;;  %v3253_v35 = vld [vmem:[%s4317_s1 + $0x2a4] ss:$16 sps:$4 sm:$0xff]   ;;  %v3257_v47 = vld [vmem:[%s4317_s1 + $0x2c0] ss:$16 sps:$4 sm:$0xff]  }
  0x4d   : > { %1560 = vmatprep.subr.bf16.mxu0 %v3179_v36  ;;  %1852 = vmatprep.subr.bf16.mxu1 %v3181_v37  ;;  %v3256_v36 = vld [vmem:[%s4317_s1 + $0x2ac] ss:$16 sps:$4 sm:$0xff]   ;;  %v275_v37 = vld [vmem:[%s3713_s11 + $0xe0] sm:$0xff] }
  0x4e   : > { %v3281_v5 = vld [vmem:[%s4317_s1 + $0x340] ss:$16 sps:$4 sm:$0xff]   ;;  %v3304_v16 = vld [vmem:[%s4317_s1 + $0x3ac] ss:$16 sps:$4 sm:$0xff]  }
  0x4f   : > { %v3299_v17 = vld [vmem:[%s4317_s1 + $0x3a0] ss:$16 sps:$4 sm:$0xff]   ;;  %v3316_v24 = vld [vmem:[%s4317_s1 + $0x3ec] ss:$16 sps:$4 sm:$0xff]  }
  0x50   : > { %1561 = vmatpush1.bf16.msra.mxu0 %v3183_v38  ;;  %1853 = vmatpush1.bf16.msra.mxu1 %v3184_v39  ;;  %v282_v38 = vld [vmem:[%s3713_s11 + $0x118] sm:$0xff]  ;;  %v3317_v31 = vld [vmem:[%s4317_s1 + $0x400] ss:$16 sps:$4 sm:$0xff]  }
  0x51   : > { %1562 = vmatprep.subr.bf16.mxu0 %v3185_v40  ;;  %1854 = vmatprep.subr.bf16.mxu1 %v3187_v41  ;;  %v317_v39 = vpack.c.bf16 %v282_v38, %v275_v37  ;;  %v3251_v40 = vld [vmem:[%s4317_s1 + $0x2a0] ss:$16 sps:$4 sm:$0xff]   ;;  %v3254_v41 = vld [vmem:[%s4317_s1 + $0x2a8] ss:$16 sps:$4 sm:$0xff]   ;;  %v3322_v30 = vld [vmem:[%s4317_s1 + $0x40c] ss:$16 sps:$4 sm:$0xff]  }
  0x52   : > { %v3328_v37 = vld [vmem:[%s4317_s1 + $0x42c] ss:$16 sps:$4 sm:$0xff]  }
  0x54   : > { %1563 = vmatpush1.bf16.msra.mxu0 %v3189_v42  ;;  %1855 = vmatpush1.bf16.msra.mxu1 %v3190_v43  ;;  %v290_v42 = vld [vmem:[%s3713_s11 + $0x158] sm:$0xff]  ;;  %v297_v43 = vld [vmem:[%s3713_s11 + $0x190] sm:$0xff] }
  0x55   : > { %1564 = vmatprep.subr.bf16.mxu0 %v3191_v44  ;;  %1856 = vmatprep.subr.bf16.mxu1 %v3193_v45  ;;  %v3259_v44 = vld [vmem:[%s4317_s1 + $0x2c4] ss:$16 sps:$4 sm:$0xff]   ;;  %v3262_v45 = vld [vmem:[%s4317_s1 + $0x2cc] ss:$16 sps:$4 sm:$0xff]   ;;  %v325_v46 = vpack.c.bf16 %v297_v43, %v290_v42 }
  0x56   : > { %v263_v42 = vld [vmem:[%s3713_s11 + $0x80] sm:$0xff]  ;;  %v270_v43 = vld [vmem:[%s3713_s11 + $0xb8] sm:$0xff] }
  0x58   : > { %1565 = vmatpush1.bf16.msra.mxu0 %v3195_v48  ;;  %1857 = vmatpush1.bf16.msra.mxu1 %v3196_v49  ;;  %v3260_v48 = vld [vmem:[%s4317_s1 + $0x2c8] ss:$16 sps:$4 sm:$0xff]   ;;  %v289_v49 = vld [vmem:[%s3713_s11 + $0x150] sm:$0xff] }
  0x59   : > { %1566 = vmatprep.subr.bf16.mxu0 %v3197_v51  ;;  %1858 = vmatprep.subr.bf16.mxu1 %v3199_v52  ;;  %v3265_v51 = vld [vmem:[%s4317_s1 + $0x2e4] ss:$16 sps:$4 sm:$0xff]   ;;  %v3268_v52 = vld [vmem:[%s4317_s1 + $0x2ec] ss:$16 sps:$4 sm:$0xff]  }
  0x5c   : > { %1567 = vmatpush1.bf16.msra.mxu0 %v3201_v53  ;;  %1859 = vmatpush1.bf16.msra.mxu1 %v3202_v54  ;;  %v324_v53 = vpack.c.bf16 %v296_v50, %v289_v49  ;;  %v250_v54 = vld [vmem:[%s3713_s11 + $0x18] sm:$0xff]  ;;  %v285_v49 = vld [vmem:[%s3713_s11 + $0x130] sm:$0xff] }
  0x5d   : > { %1568 = vmatprep.subr.bf16.mxu0 %v3203_v55  ;;  %1860 = vmatprep.subr.bf16.mxu1 %v3205_v56  ;;  %v257_v55 = vld [vmem:[%s3713_s11 + $0x50] sm:$0xff] }
  0x5e   : > { %v3263_v56 = vld [vmem:[%s4317_s1 + $0x2e0] ss:$16 sps:$4 sm:$0xff]   ;;  %v3337_v50 = vld [vmem:[%s4317_s1 + $0x464] ss:$16 sps:$4 sm:$0xff]  }
  0x60   : > { %1569 = vmatpush1.bf16.msra.mxu0 %v3207_v57  ;;  %1861 = vmatpush1.bf16.msra.mxu1 %v3208_v58  ;;  %v3266_v57 = vld [vmem:[%s4317_s1 + $0x2e8] ss:$16 sps:$4 sm:$0xff]   ;;  %v306_v58 = vpack.c.bf16 %v257_v55, %v250_v54  ;;  %v3343_v55 = vld [vmem:[%s4317_s1 + $0x484] ss:$16 sps:$4 sm:$0xff]  }
  0x61   : > { %1570 = vmatprep.subr.bf16.mxu0 %v3209_v59  ;;  %1862 = vmatprep.subr.bf16.mxu1 %v3211_v60  ;;  %v3271_v59 = vld [vmem:[%s4317_s1 + $0x304] ss:$16 sps:$4 sm:$0xff]   ;;  %v3274_v60 = vld [vmem:[%s4317_s1 + $0x30c] ss:$16 sps:$4 sm:$0xff]   ;;  %v3338_v54 = vld [vmem:[%s4317_s1 + $0x468] ss:$16 sps:$4 sm:$0xff]  }
  0x64   : > { %1571 = vmatpush1.bf16.msra.mxu0 %v3213_v61  ;;  %1863 = vmatpush1.bf16.msra.mxu1 %v3214_v62  ;;  %v3269_v61 = vld [vmem:[%s4317_s1 + $0x300] ss:$16 sps:$4 sm:$0xff]   ;;  %v3272_v62 = vld [vmem:[%s4317_s1 + $0x308] ss:$16 sps:$4 sm:$0xff]  }
  0x65   : > { %1572 = vmatprep.subr.bf16.mxu0 %v3215_v63  ;;  %1864 = vmatprep.subr.bf16.mxu1 %v3217_v0  ;;  %v3277_v63 = vld [vmem:[%s4317_s1 + $0x324] ss:$16 sps:$4 sm:$0xff]   ;;  %v3280_v0 = vld [vmem:[%s4317_s1 + $0x32c] ss:$16 sps:$4 sm:$0xff]  }
  0x68   : > { %1573 = vmatpush1.bf16.msra.mxu0 %v3219_v1  ;;  %1865 = vmatpush1.bf16.msra.mxu1 %v3220_v2  ;;  %v3275_v1 = vld [vmem:[%s4317_s1 + $0x320] ss:$16 sps:$4 sm:$0xff]   ;;  %v3278_v2 = vld [vmem:[%s4317_s1 + $0x328] ss:$16 sps:$4 sm:$0xff]  }
  0x69   : > { %1615 = vmatprep.subr.bf16.mxu0 %v3223_v3  ;;  %1907 = vmatprep.subr.bf16.mxu1 %v3226_v6  ;;  %v3283_v3 = vld [vmem:[%s4317_s1 + $0x344] ss:$16 sps:$4 sm:$0xff]   ;;  %v3284_v6 = vld [vmem:[%s4317_s1 + $0x348] ss:$16 sps:$4 sm:$0xff]  }
  0x6b   : > { %1575 = vmatmul.mubr.bf16.vlgmr.msra.gmra.mrb[0].mxu0 %v303_v9  ;;  %1867 = vmatmul.mubr.bf16.vlgmr.msra.gmra.mrb[0].mxu1 %v303_v9  ;;  %v3287_v9 = vld [vmem:[%s4317_s1 + $0x360] ss:$16 sps:$4 sm:$0xff]  }
  0x6c   : > { %1616 = vmatpush1.bf16.msra.mxu0 %v3221_v7  ;;  %1908 = vmatpush1.bf16.msra.mxu1 %v3224_v8  ;;  %v3289_v7 = vld [vmem:[%s4317_s1 + $0x364] ss:$16 sps:$4 sm:$0xff]   ;;  %v3292_v8 = vld [vmem:[%s4317_s1 + $0x36c] ss:$16 sps:$4 sm:$0xff]  }
  0x6d   : > { %1617 = vmatprep.subr.bf16.mxu0 %v3229_v10  ;;  %1909 = vmatprep.subr.bf16.mxu1 %v3232_v11  ;;  %v3290_v10 = vld [vmem:[%s4317_s1 + $0x368] ss:$16 sps:$4 sm:$0xff]   ;;  %v3295_v11 = vld [vmem:[%s4317_s1 + $0x384] ss:$16 sps:$4 sm:$0xff]  }
  0x6e   : > { %1584 = vmatprep.mubr.bf16.mxu0 %v311_v20  ;;  %1876 = vmatprep.mubr.bf16.mxu1 %v311_v20  ;;  %v3310_v20 = vld [vmem:[%s4317_s1 + $0x3cc] ss:$16 sps:$4 sm:$0xff]  }
  0x70   : > { %1618 = vmatpush1.bf16.msra.mxu0 %v3227_v12  ;;  %1910 = vmatpush1.bf16.msra.mxu1 %v3230_v13  ;;  %v3298_v12 = vld [vmem:[%s4317_s1 + $0x38c] ss:$16 sps:$4 sm:$0xff]   ;;  %v3293_v13 = vld [vmem:[%s4317_s1 + $0x380] ss:$16 sps:$4 sm:$0xff]  }
  0x71   : > { %1619 = vmatprep.subr.bf16.mxu0 %v3235_v14  ;;  %1911 = vmatprep.subr.bf16.mxu1 %v3238_v15  ;;  %v3296_v14 = vld [vmem:[%s4317_s1 + $0x388] ss:$16 sps:$4 sm:$0xff]   ;;  %v3301_v15 = vld [vmem:[%s4317_s1 + $0x3a4] ss:$16 sps:$4 sm:$0xff]  }
  0x73   : > { %1585 = vmatmul.mubr.bf16.gmra.mrb[4].mxu0 %v310_v27  ;;  %1877 = vmatmul.mubr.bf16.gmra.mrb[4].mxu1 %v310_v27  ;;  %v249_v27 = vld [vmem:[%s3713_s11 + $0x10] sm:$0xff] }
  0x74   : > { %1620 = vmatpush1.bf16.msra.mxu0 %v3233_v18  ;;  %1912 = vmatpush1.bf16.msra.mxu1 %v3236_v19  ;;  %v3302_v18 = vld [vmem:[%s4317_s1 + $0x3a8] ss:$16 sps:$4 sm:$0xff]   ;;  %v3307_v19 = vld [vmem:[%s4317_s1 + $0x3c4] ss:$16 sps:$4 sm:$0xff]  }
  0x75   : > { %1621 = vmatprep.subr.bf16.mxu0 %v3241_v21  ;;  %1913 = vmatprep.subr.bf16.mxu1 %v3244_v22  ;;  %v3305_v21 = vld [vmem:[%s4317_s1 + $0x3c0] ss:$16 sps:$4 sm:$0xff]   ;;  %v3308_v22 = vld [vmem:[%s4317_s1 + $0x3c8] ss:$16 sps:$4 sm:$0xff]  }
  0x76   : > { %1594 = vmatprep.mubr.bf16.mxu0 %v318_v33  ;;  %1886 = vmatprep.mubr.bf16.mxu1 %v318_v33 }
  0x78   : > { %1622 = vmatpush1.bf16.msra.mxu0 %v3239_v25  ;;  %1914 = vmatpush1.bf16.msra.mxu1 %v3242_v26  ;;  %v3311_v25 = vld [vmem:[%s4317_s1 + $0x3e0] ss:$16 sps:$4 sm:$0xff]   ;;  %v3314_v26 = vld [vmem:[%s4317_s1 + $0x3e8] ss:$16 sps:$4 sm:$0xff]  }
  0x79   : > { %1623 = vmatprep.subr.bf16.mxu0 %v3247_v28  ;;  %1915 = vmatprep.subr.bf16.mxu1 %v3250_v29  ;;  %v256_v28 = vld [vmem:[%s3713_s11 + $0x48] sm:$0xff]  ;;  %v3319_v29 = vld [vmem:[%s4317_s1 + $0x404] ss:$16 sps:$4 sm:$0xff]  }
  0x7a   : > { %v305_v33 = vpack.c.bf16 %v256_v28, %v249_v27  ;;  %v3379_v27 = vld [vmem:[%s4317_s1 + $0x544] ss:$16 sps:$4 sm:$0xff]   ;;  %v3382_v28 = vld [vmem:[%s4317_s1 + $0x54c] ss:$16 sps:$4 sm:$0xff]  }
  0x7b   : > { %1595 = vmatmul.mubr.bf16.gmra.mrb[8].mxu0 %v317_v39  ;;  %1887 = vmatmul.mubr.bf16.gmra.mrb[8].mxu1 %v317_v39  ;;  %v3323_v39 = vld [vmem:[%s4317_s1 + $0x420] ss:$16 sps:$4 sm:$0xff]  }
  0x7c   : > { %1624 = vmatpush1.bf16.msra.mxu0 %v3245_v32  ;;  %1916 = vmatpush1.bf16.msra.mxu1 %v3248_v34  ;;  %v3320_v32 = vld [vmem:[%s4317_s1 + $0x408] ss:$16 sps:$4 sm:$0xff]  }
  0x7d   : > { %1625 = vmatprep.subr.bf16.mxu0 %v3253_v35  ;;  %1917 = vmatprep.subr.bf16.mxu1 %v3256_v36  ;;  %v264_v34 = vld [vmem:[%s3713_s11 + $0x88] sm:$0xff]  ;;  %v271_v35 = vld [vmem:[%s3713_s11 + $0xc0] sm:$0xff] }
  0x7e   : > { %1604 = vmatprep.mubr.bf16.mxu0 %v325_v46  ;;  %1896 = vmatprep.mubr.bf16.mxu1 %v325_v46  ;;  %v3325_v36 = vld [vmem:[%s4317_s1 + $0x424] ss:$16 sps:$4 sm:$0xff]   ;;  %v313_v38 = vpack.c.bf16 %v271_v35, %v264_v34  ;;  %v3332_v46 = vld [vmem:[%s4317_s1 + $0x448] ss:$16 sps:$4 sm:$0xff]  }
  0x7f   : > { %v3386_v34 = vld [vmem:[%s4317_s1 + $0x568] ss:$16 sps:$4 sm:$0xff]   ;;  %v3391_v35 = vld [vmem:[%s4317_s1 + $0x584] ss:$16 sps:$4 sm:$0xff]  }
  0x80   : > { %1626 = vmatpush1.bf16.msra.mxu0 %v3251_v40  ;;  %1918 = vmatpush1.bf16.msra.mxu1 %v3254_v41  ;;  %v3326_v40 = vld [vmem:[%s4317_s1 + $0x428] ss:$16 sps:$4 sm:$0xff]   ;;  %v3331_v41 = vld [vmem:[%s4317_s1 + $0x444] ss:$16 sps:$4 sm:$0xff]  }
  0x81   : > { %1627 = vmatprep.subr.bf16.mxu0 %v3259_v44  ;;  %1919 = vmatprep.subr.bf16.mxu1 %v3262_v45  ;;  %v3334_v44 = vld [vmem:[%s4317_s1 + $0x44c] ss:$16 sps:$4 sm:$0xff]   ;;  %v3329_v45 = vld [vmem:[%s4317_s1 + $0x440] ss:$16 sps:$4 sm:$0xff]  }
  0x83   : > { %1605 = vmatmul.mubr.bf16.gmra.mrb[12].mxu0 %v324_v53  ;;  %1897 = vmatmul.mubr.bf16.gmra.mrb[12].mxu1 %v324_v53 }
  0x84   : > { %1628 = vmatpush1.bf16.msra.mxu0 %v3257_v47  ;;  %1920 = vmatpush1.bf16.msra.mxu1 %v3260_v48  ;;  %v312_v47 = vpack.c.bf16 %v270_v43, %v263_v42  ;;  %v278_v48 = vld [vmem:[%s3713_s11 + $0xf8] sm:$0xff]  ;;  %v3403_v43 = vld [vmem:[%s4317_s1 + $0x5c4] ss:$16 sps:$4 sm:$0xff]  }
  0x85   : > { %1629 = vmatprep.subr.bf16.mxu0 %v3265_v51  ;;  %1921 = vmatprep.subr.bf16.mxu1 %v3268_v52  ;;  %v3340_v51 = vld [vmem:[%s4317_s1 + $0x46c] ss:$16 sps:$4 sm:$0xff]   ;;  %v3335_v52 = vld [vmem:[%s4317_s1 + $0x460] ss:$16 sps:$4 sm:$0xff]   ;;  %v320_v53 = vpack.c.bf16 %v285_v49, %v278_v48  ;;  %v3398_v42 = vld [vmem:[%s4317_s1 + $0x5a8] ss:$16 sps:$4 sm:$0xff]  }
  0x86   : > { %1647 = vmatprep.mubr.bf16.mxu0 %v306_v58  ;;  %1939 = vmatprep.mubr.bf16.mxu1 %v306_v58  ;;  %v3346_v58 = vld [vmem:[%s4317_s1 + $0x48c] ss:$16 sps:$4 sm:$0xff]   ;;  %v3407_v49 = vld [vmem:[%s4317_s1 + $0x5e0] ss:$16 sps:$4 sm:$0xff]  }
  0x87   : > { %v3412_v48 = vld [vmem:[%s4317_s1 + $0x5ec] ss:$16 sps:$4 sm:$0xff]  }
  0x88   : > { %1630 = vmatpush1.bf16.msra.mxu0 %v3263_v56  ;;  %1922 = vmatpush1.bf16.msra.mxu1 %v3266_v57  ;;  %v277_v56 = vld [vmem:[%s3713_s11 + $0xf0] sm:$0xff]  ;;  %v284_v57 = vld [vmem:[%s3713_s11 + $0x128] sm:$0xff] }
  0x89   : > { %1631 = vmatprep.subr.bf16.mxu0 %v3271_v59  ;;  %1923 = vmatprep.subr.bf16.mxu1 %v3274_v60  ;;  %v319_v59 = vpack.c.bf16 %v284_v57, %v277_v56  ;;  %v292_v60 = vld [vmem:[%s3713_s11 + $0x168] sm:$0xff]  ;;  %v273_v56 = vld [vmem:[%s3713_s11 + $0xd0] sm:$0xff] }
  0x8c   : > { %1632 = vmatpush1.bf16.msra.mxu0 %v3269_v61  ;;  %1924 = vmatpush1.bf16.msra.mxu1 %v3272_v62  ;;  %v299_v61 = vld [vmem:[%s3713_s11 + $0x1a0] sm:$0xff] }
  0x8d   : > { %1633 = vmatprep.subr.bf16.mxu0 %v3277_v63  ;;  %1925 = vmatprep.subr.bf16.mxu1 %v3280_v0  ;;  %v3341_v62 = vld [vmem:[%s4317_s1 + $0x480] ss:$16 sps:$4 sm:$0xff]   ;;  %v3344_v63 = vld [vmem:[%s4317_s1 + $0x488] ss:$16 sps:$4 sm:$0xff]   ;;  %v3349_v0 = vld [vmem:[%s4317_s1 + $0x4a4] ss:$16 sps:$4 sm:$0xff]  }
  0x90   : > { %1634 = vmatpush1.bf16.msra.mxu0 %v3275_v1  ;;  %1926 = vmatpush1.bf16.msra.mxu1 %v3278_v2  ;;  %v3352_v1 = vld [vmem:[%s4317_s1 + $0x4ac] ss:$16 sps:$4 sm:$0xff]   ;;  %v327_v2 = vpack.c.bf16 %v299_v61, %v292_v60  ;;  %v3419_v61 = vld [vmem:[#allocation2 + $0x40] sm:$0xff]  }
  0x91   : > { %1635 = vmatprep.subr.bf16.mxu0 %v3283_v3  ;;  %1927 = vmatprep.subr.bf16.mxu1 %v3286_v4  ;;  %v3347_v3 = vld [vmem:[%s4317_s1 + $0x4a0] ss:$16 sps:$4 sm:$0xff]   ;;  %v3350_v4 = vld [vmem:[%s4317_s1 + $0x4a8] ss:$16 sps:$4 sm:$0xff]  }
  0x94   : > { %1636 = vmatpush1.bf16.msra.mxu0 %v3281_v5  ;;  %1928 = vmatpush1.bf16.msra.mxu1 %v3284_v6  ;;  %v3355_v5 = vld [vmem:[%s4317_s1 + $0x4c4] ss:$16 sps:$4 sm:$0xff]  }
  0x95   : > { %1637 = vmatprep.subr.bf16.mxu0 %v3289_v7  ;;  %1929 = vmatprep.subr.bf16.mxu1 %v3292_v8  ;;  %v291_v6 = vld [vmem:[%s3713_s11 + $0x160] sm:$0xff]  ;;  %v298_v7 = vld [vmem:[%s3713_s11 + $0x198] sm:$0xff] }
  0x96   : > { %v3358_v8 = vld [vmem:[%s4317_s1 + $0x4cc] ss:$16 sps:$4 sm:$0xff]  }
  0x98   : > { %1638 = vmatpush1.bf16.msra.mxu0 %v3287_v9  ;;  %1930 = vmatpush1.bf16.msra.mxu1 %v3290_v10  ;;  %v3353_v9 = vld [vmem:[%s4317_s1 + $0x4c0] ss:$16 sps:$4 sm:$0xff]   ;;  %v3356_v10 = vld [vmem:[%s4317_s1 + $0x4c8] ss:$16 sps:$4 sm:$0xff]  }
  0x99   : > { %1639 = vmatprep.subr.bf16.mxu0 %v3295_v11  ;;  %1931 = vmatprep.subr.bf16.mxu1 %v3298_v12  ;;  %v252_v11 = vld [vmem:[%s3713_s11 + $0x28] sm:$0xff]  ;;  %v326_v12 = vpack.c.bf16 %v298_v7, %v291_v6  ;;  %v286_v6 = vld [vmem:[%s3713_s11 + $0x138] sm:$0xff] }
  0x9a   : > { %v294_v7 = vld [vmem:[%s3713_s11 + $0x178] sm:$0xff] }
  0x9c   : > { %1640 = vmatpush1.bf16.msra.mxu0 %v3293_v13  ;;  %1932 = vmatpush1.bf16.msra.mxu1 %v3296_v14  ;;  %v259_v13 = vld [vmem:[%s3713_s11 + $0x60] sm:$0xff] }
  0x9d   : > { %1641 = vmatprep.subr.bf16.mxu0 %v3301_v15  ;;  %1933 = vmatprep.subr.bf16.mxu1 %v3304_v16  ;;  %v3361_v14 = vld [vmem:[%s4317_s1 + $0x4e4] ss:$16 sps:$4 sm:$0xff]   ;;  %v3364_v15 = vld [vmem:[%s4317_s1 + $0x4ec] ss:$16 sps:$4 sm:$0xff]   ;;  %v3359_v16 = vld [vmem:[%s4317_s1 + $0x4e0] ss:$16 sps:$4 sm:$0xff]  }
  0xa0   : > { %1642 = vmatpush1.bf16.msra.mxu0 %v3299_v17  ;;  %1934 = vmatpush1.bf16.msra.mxu1 %v3302_v18  ;;  %v308_v17 = vpack.c.bf16 %v259_v13, %v252_v11  ;;  %v3362_v18 = vld [vmem:[%s4317_s1 + $0x4e8] ss:$16 sps:$4 sm:$0xff]   ;;  %v293_v11 = vld [vmem:[%s3713_s11 + $0x170] sm:$0xff] }
  0xa1   : > { %1643 = vmatprep.subr.bf16.mxu0 %v3307_v19  ;;  %1935 = vmatprep.subr.bf16.mxu1 %v3310_v20  ;;  %v3367_v19 = vld [vmem:[%s4317_s1 + $0x504] ss:$16 sps:$4 sm:$0xff]   ;;  %v3370_v20 = vld [vmem:[%s4317_s1 + $0x50c] ss:$16 sps:$4 sm:$0xff]  }
  0xa4   : > { %1644 = vmatpush1.bf16.msra.mxu0 %v3305_v21  ;;  %1936 = vmatpush1.bf16.msra.mxu1 %v3308_v22  ;;  %v3365_v21 = vld [vmem:[%s4317_s1 + $0x500] ss:$16 sps:$4 sm:$0xff]   ;;  %v3368_v22 = vld [vmem:[%s4317_s1 + $0x508] ss:$16 sps:$4 sm:$0xff]  }
  0xa5   : > { %1645 = vmatprep.subr.bf16.mxu0 %v3313_v23  ;;  %1937 = vmatprep.subr.bf16.mxu1 %v3316_v24  ;;  %v3373_v23 = vld [vmem:[%s4317_s1 + $0x524] ss:$16 sps:$4 sm:$0xff]   ;;  %v3376_v24 = vld [vmem:[%s4317_s1 + $0x52c] ss:$16 sps:$4 sm:$0xff]  }
  0xa8   : > { %1646 = vmatpush1.bf16.msra.mxu0 %v3311_v25  ;;  %1938 = vmatpush1.bf16.msra.mxu1 %v3314_v26  ;;  %v3371_v25 = vld [vmem:[%s4317_s1 + $0x520] ss:$16 sps:$4 sm:$0xff]   ;;  %v3374_v26 = vld [vmem:[%s4317_s1 + $0x528] ss:$16 sps:$4 sm:$0xff]  }
  0xa9   : > { %1688 = vmatprep.subr.bf16.mxu0 %v3319_v29  ;;  %1980 = vmatprep.subr.bf16.mxu1 %v3322_v30  ;;  %v3377_v29 = vld [vmem:[%s4317_s1 + $0x540] ss:$16 sps:$4 sm:$0xff]   ;;  %v3380_v30 = vld [vmem:[%s4317_s1 + $0x548] ss:$16 sps:$4 sm:$0xff]  }
  0xab   : > { %1648 = vmatmul.mubr.bf16.vlgmr.msra.gmra.mrb[0].mxu0 %v305_v33  ;;  %1940 = vmatmul.mubr.bf16.vlgmr.msra.gmra.mrb[0].mxu1 %v305_v33  ;;  %v3383_v33 = vld [vmem:[%s4317_s1 + $0x560] ss:$16 sps:$4 sm:$0xff]  }
  0xac   : > { %1689 = vmatpush1.bf16.msra.mxu0 %v3317_v31  ;;  %1981 = vmatpush1.bf16.msra.mxu1 %v3320_v32  ;;  %v3385_v31 = vld [vmem:[%s4317_s1 + $0x564] ss:$16 sps:$4 sm:$0xff]   ;;  %v3388_v32 = vld [vmem:[%s4317_s1 + $0x56c] ss:$16 sps:$4 sm:$0xff]  }
  0xad   : > { %1690 = vmatprep.subr.bf16.mxu0 %v3325_v36  ;;  %1982 = vmatprep.subr.bf16.mxu1 %v3328_v37  ;;  %v3394_v36 = vld [vmem:[%s4317_s1 + $0x58c] ss:$16 sps:$4 sm:$0xff]   ;;  %v3389_v37 = vld [vmem:[%s4317_s1 + $0x580] ss:$16 sps:$4 sm:$0xff]  }
  0xae   : > { %1657 = vmatprep.mubr.bf16.mxu0 %v313_v38  ;;  %1949 = vmatprep.mubr.bf16.mxu1 %v313_v38  ;;  %v3392_v38 = vld [vmem:[%s4317_s1 + $0x588] ss:$16 sps:$4 sm:$0xff]  }
  0xb0   : > { %1691 = vmatpush1.bf16.msra.mxu0 %v3323_v39  ;;  %1983 = vmatpush1.bf16.msra.mxu1 %v3326_v40  ;;  %v3397_v39 = vld [vmem:[%s4317_s1 + $0x5a4] ss:$16 sps:$4 sm:$0xff]   ;;  %v3400_v40 = vld [vmem:[%s4317_s1 + $0x5ac] ss:$16 sps:$4 sm:$0xff]  }
  0xb1   : > { %1692 = vmatprep.subr.bf16.mxu0 %v3331_v41  ;;  %1984 = vmatprep.subr.bf16.mxu1 %v3334_v44  ;;  %v3395_v41 = vld [vmem:[%s4317_s1 + $0x5a0] ss:$16 sps:$4 sm:$0xff]   ;;  %v3406_v44 = vld [vmem:[%s4317_s1 + $0x5cc] ss:$16 sps:$4 sm:$0xff]  }
  0xb3   : > { %1658 = vmatmul.mubr.bf16.gmra.mrb[4].mxu0 %v312_v47  ;;  %1950 = vmatmul.mubr.bf16.gmra.mrb[4].mxu1 %v312_v47  ;;  %v3409_v47 = vld [vmem:[%s4317_s1 + $0x5e4] ss:$16 sps:$4 sm:$0xff]  }
  0xb4   : > { %1693 = vmatpush1.bf16.msra.mxu0 %v3329_v45  ;;  %1985 = vmatpush1.bf16.msra.mxu1 %v3332_v46  ;;  %v3401_v45 = vld [vmem:[%s4317_s1 + $0x5c0] ss:$16 sps:$4 sm:$0xff]   ;;  %v3404_v46 = vld [vmem:[%s4317_s1 + $0x5c8] ss:$16 sps:$4 sm:$0xff]  }
  0xb5   : > { %1694 = vmatprep.subr.bf16.mxu0 %v3337_v50  ;;  %1986 = vmatprep.subr.bf16.mxu1 %v3340_v51  ;;  %v3410_v50 = vld [vmem:[%s4317_s1 + $0x5e8] ss:$16 sps:$4 sm:$0xff]   ;;  %v251_v51 = vld [vmem:[%s3713_s11 + $0x20] sm:$0xff] }
  0xb6   : > { %1667 = vmatprep.mubr.bf16.mxu0 %v320_v53  ;;  %1959 = vmatprep.mubr.bf16.mxu1 %v320_v53  ;;  %v3415_v53 = vld [vmem:[%s4317_s1 + $0x604] ss:$16 sps:$4 sm:$0xff]  }
  0xb8   : > { %1695 = vmatpush1.bf16.msra.mxu0 %v3335_v52  ;;  %1987 = vmatpush1.bf16.msra.mxu1 %v3338_v54  ;;  %v258_v52 = vld [vmem:[%s3713_s11 + $0x58] sm:$0xff] }
  0xb9   : > { %1696 = vmatprep.subr.bf16.mxu0 %v3343_v55  ;;  %1988 = vmatprep.subr.bf16.mxu1 %v3346_v58  ;;  %v3418_v54 = vld [vmem:[%s4317_s1 + $0x60c] ss:$16 sps:$4 sm:$0xff]   ;;  %v307_v57 = vpack.c.bf16 %v258_v52, %v251_v51  ;;  %v3413_v58 = vld [vmem:[%s4317_s1 + $0x600] ss:$16 sps:$4 sm:$0xff]  }
  0xba   : > { %v266_v55 = vld [vmem:[%s3713_s11 + $0x98] sm:$0xff]  ;;  %v3445_v51 = vld [vmem:[#allocation2 + $0x30] sm:$0xff]  }
  0xbb   : > { %1668 = vmatmul.mubr.bf16.gmra.mrb[8].mxu0 %v319_v59  ;;  %1960 = vmatmul.mubr.bf16.gmra.mrb[8].mxu1 %v319_v59  ;;  %v3416_v59 = vld [vmem:[%s4317_s1 + $0x608] ss:$16 sps:$4 sm:$0xff]   ;;  %v315_v60 = vpack.c.bf16 %v273_v56, %v266_v55  ;;  %v3446_v52 = vld [vmem:[#allocation2 + $0xb0] sm:$0xff]  }
  0xbc   : > { %1697 = vmatpush1.bf16.msra.mxu0 %v3341_v62  ;;  %1989 = vmatpush1.bf16.msra.mxu1 %v3344_v63  ;;  %v3420_v62 = vld [vmem:[#allocation2 + $0xc0] sm:$0xff]   ;;  %v265_v63 = vld [vmem:[%s3713_s11 + $0x90] sm:$0xff]  ;;  %v3449_v55 = vld [vmem:[#allocation2 + $0x38] sm:$0xff]  }
  0xbd   : > { %1698 = vmatprep.subr.bf16.mxu0 %v3349_v0  ;;  %1990 = vmatprep.subr.bf16.mxu1 %v3352_v1  ;;  %v272_v0 = vld [vmem:[%s3713_s11 + $0xc8] sm:$0xff]  ;;  %v3450_v56 = vld [vmem:[#allocation2 + $0xb8] sm:$0xff]  }
  0xbe   : > { %1677 = vmatprep.mubr.bf16.mxu0 %v327_v2  ;;  %1969 = vmatprep.mubr.bf16.mxu1 %v327_v2  ;;  %v280_v1 = vld [vmem:[%s3713_s11 + $0x108] sm:$0xff]  ;;  %v287_v2 = vld [vmem:[%s3713_s11 + $0x140] sm:$0xff] }
  0xc0   : > { %1699 = vmatpush1.bf16.msra.mxu0 %v3347_v3  ;;  %1991 = vmatpush1.bf16.msra.mxu1 %v3350_v4  ;;  %v314_v3 = vpack.c.bf16 %v272_v0, %v265_v63  ;;  %v322_v4 = vpack.c.bf16 %v287_v2, %v280_v1 }
  0xc1   : > { %1700 = vmatprep.subr.bf16.mxu0 %v3355_v5  ;;  %1992 = vmatprep.subr.bf16.mxu1 %v3358_v8  ;;  %v279_v5 = vld [vmem:[%s3713_s11 + $0x100] sm:$0xff]  ;;  %v301_v8 = vld [vmem:[%s3713_s11 + $0x1b0] sm:$0xff] }
  0xc3   : > { %1678 = vmatmul.mubr.bf16.gmra.mrb[12].mxu0 %v326_v12  ;;  %1970 = vmatmul.mubr.bf16.gmra.mrb[12].mxu1 %v326_v12  ;;  %v300_v12 = vld [vmem:[%s3713_s11 + $0x1a8] sm:$0xff] }
  0xc4   : > { %1701 = vmatpush1.bf16.msra.mxu0 %v3353_v9  ;;  %1993 = vmatpush1.bf16.msra.mxu1 %v3356_v10  ;;  %v321_v9 = vpack.c.bf16 %v286_v6, %v279_v5  ;;  %v329_v10 = vpack.c.bf16 %v301_v8, %v294_v7  ;;  %v328_v13 = vpack.c.bf16 %v300_v12, %v293_v11 }
  0xc5   : > { %1702 = vmatprep.subr.bf16.mxu0 %v3361_v14  ;;  %1994 = vmatprep.subr.bf16.mxu1 %v3364_v15  ;;  %v3494_v14 = vmov 0   ;;  %v253_v15 = vld [vmem:[%s3713_s11 + $0x30] sm:$0xff] }
  0xc6   : > { %1720 = vmatprep.mubr.bf16.mxu0 %v308_v17  ;;  %2012 = vmatprep.mubr.bf16.mxu1 %v308_v17 }
  0xc8   : > { %1703 = vmatpush1.bf16.msra.mxu0 %v3359_v16  ;;  %1995 = vmatpush1.bf16.msra.mxu1 %v3362_v18  ;;  %v260_v16 = vld [vmem:[%s3713_s11 + $0x68] sm:$0xff]  ;;  %v3421_v18 = vld [vmem:[#allocation2] sm:$0xff]  }
  0xc9   : > { %1704 = vmatprep.subr.bf16.mxu0 %v3367_v19  ;;  %1996 = vmatprep.subr.bf16.mxu1 %v3370_v20  ;;  %v309_v17 = vpack.c.bf16 %v260_v16, %v253_v15  ;;  %v3422_v19 = vld [vmem:[#allocation2 + $0x80] sm:$0xff]   ;;  %v3423_v20 = vld [vmem:[#allocation2 + $0x48] sm:$0xff]  }
  0xcc   : > { %1705 = vmatpush1.bf16.msra.mxu0 %v3365_v21  ;;  %1997 = vmatpush1.bf16.msra.mxu1 %v3368_v22  ;;  %v3424_v21 = vld [vmem:[#allocation2 + $0xc8] sm:$0xff]   ;;  %v267_v22 = vld [vmem:[%s3713_s11 + $0xa0] sm:$0xff] }
  0xcd   : > { %1706 = vmatprep.subr.bf16.mxu0 %v3373_v23  ;;  %1998 = vmatprep.subr.bf16.mxu1 %v3376_v24  ;;  %v274_v23 = vld [vmem:[%s3713_s11 + $0xd8] sm:$0xff]  ;;  %v3425_v24 = vld [vmem:[#allocation2 + $0x8] sm:$0xff]  }
  0xd0   : > { %1707 = vmatpush1.bf16.msra.mxu0 %v3371_v25  ;;  %1999 = vmatpush1.bf16.msra.mxu1 %v3374_v26  ;;  %v3426_v25 = vld [vmem:[#allocation2 + $0x88] sm:$0xff]   ;;  %v3427_v26 = vld [vmem:[#allocation2 + $0x50] sm:$0xff]  }
  0xd1   : > { %1708 = vmatprep.subr.bf16.mxu0 %v3379_v27  ;;  %2000 = vmatprep.subr.bf16.mxu1 %v3382_v28  ;;  %v3428_v27 = vld [vmem:[#allocation2 + $0xd0] sm:$0xff]   ;;  %v316_v28 = vpack.c.bf16 %v274_v23, %v267_v22 }
  0xd4   : > { %1709 = vmatpush1.bf16.msra.mxu0 %v3377_v29  ;;  %2001 = vmatpush1.bf16.msra.mxu1 %v3380_v30  ;;  %v3429_v29 = vld [vmem:[#allocation2 + $0x10] sm:$0xff]  }
  0xd5   : > { %1710 = vmatprep.subr.bf16.mxu0 %v3385_v31  ;;  %2002 = vmatprep.subr.bf16.mxu1 %v3388_v32  ;;  %v3430_v30 = vld [vmem:[#allocation2 + $0x90] sm:$0xff]   ;;  %v3431_v31 = vld [vmem:[#allocation2 + $0x58] sm:$0xff]  }
  0xd6   : > { %v3432_v32 = vld [vmem:[#allocation2 + $0xd8] sm:$0xff]  }
  0xd8   : > { %1711 = vmatpush1.bf16.msra.mxu0 %v3383_v33  ;;  %2003 = vmatpush1.bf16.msra.mxu1 %v3386_v34  ;;  %v281_v33 = vld [vmem:[%s3713_s11 + $0x110] sm:$0xff]  ;;  %v288_v34 = vld [vmem:[%s3713_s11 + $0x148] sm:$0xff] }
  0xd9   : > { %1712 = vmatprep.subr.bf16.mxu0 %v3391_v35  ;;  %2004 = vmatprep.subr.bf16.mxu1 %v3394_v36  ;;  %v3433_v35 = vld [vmem:[#allocation2 + $0x18] sm:$0xff]  }
  0xda   : > { %v3434_v36 = vld [vmem:[#allocation2 + $0x98] sm:$0xff]  }
  0xdc   : > { %1713 = vmatpush1.bf16.msra.mxu0 %v3389_v37  ;;  %2005 = vmatpush1.bf16.msra.mxu1 %v3392_v38  ;;  %v3435_v37 = vld [vmem:[#allocation2 + $0x60] sm:$0xff]  }
  0xdd   : > { %1714 = vmatprep.subr.bf16.mxu0 %v3397_v39  ;;  %2006 = vmatprep.subr.bf16.mxu1 %v3400_v40  ;;  %v3436_v38 = vld [vmem:[#allocation2 + $0xe0] sm:$0xff]   ;;  %v323_v39 = vpack.c.bf16 %v288_v34, %v281_v33 }
  0xde   : > { %v3437_v40 = vld [vmem:[#allocation2 + $0x20] sm:$0xff]  }
  0xe0   : > { %1715 = vmatpush1.bf16.msra.mxu0 %v3395_v41  ;;  %2007 = vmatpush1.bf16.msra.mxu1 %v3398_v42  ;;  %v3438_v41 = vld [vmem:[#allocation2 + $0xa0] sm:$0xff]   ;;  %v3439_v42 = vld [vmem:[#allocation2 + $0x68] sm:$0xff]  }
  0xe1   : > { %1716 = vmatprep.subr.bf16.mxu0 %v3403_v43  ;;  %2008 = vmatprep.subr.bf16.mxu1 %v3406_v44  ;;  %v3440_v43 = vld [vmem:[#allocation2 + $0xe8] sm:$0xff]   ;;  %v295_v44 = vld [vmem:[%s3713_s11 + $0x180] sm:$0xff] }
  0xe4   : > { %1717 = vmatpush1.bf16.msra.mxu0 %v3401_v45  ;;  %2009 = vmatpush1.bf16.msra.mxu1 %v3404_v46  ;;  %v302_v45 = vld [vmem:[%s3713_s11 + $0x1b8] sm:$0xff] }
  0xe5   : > { %1718 = vmatprep.subr.bf16.mxu0 %v3409_v47  ;;  %2010 = vmatprep.subr.bf16.mxu1 %v3412_v48  ;;  %v330_v46 = vpack.c.bf16 %v302_v45, %v295_v44  ;;  %v3441_v47 = vld [vmem:[#allocation2 + $0x28] sm:$0xff]  }
  0xe6   : > { %v3442_v48 = vld [vmem:[#allocation2 + $0xa8] sm:$0xff]  }
  0xe8   : > { %1719 = vmatpush1.bf16.msra.mxu0 %v3407_v49  ;;  %2011 = vmatpush1.bf16.msra.mxu1 %v3410_v50  ;;  %v3443_v49 = vld [vmem:[#allocation2 + $0x70] sm:$0xff]  }
  0xe9   : > { %1761 = vmatprep.subr.bf16.mxu0 %v3415_v53  ;;  %2053 = vmatprep.subr.bf16.mxu1 %v3418_v54  ;;  %v3444_v50 = vld [vmem:[#allocation2 + $0xf0] sm:$0xff]   ;;  %v3447_v53 = vld [vmem:[#allocation2 + $0x78] sm:$0xff]  }
  0xea   : > { %v3448_v54 = vld [vmem:[#allocation2 + $0xf8] sm:$0xff]  }
  0xeb   : > { %1721 = vmatmul.mubr.bf16.vlgmr.msra.gmra.mrb[0].mxu0 %v307_v57  ;;  %2013 = vmatmul.mubr.bf16.vlgmr.msra.gmra.mrb[0].mxu1 %v307_v57  ;;  %v529_v57 = vlaneseq }
  0xec   : > { %1762 = vmatpush1.bf16.msra.mxu0 %v3413_v58  ;;  %2054 = vmatpush1.bf16.msra.mxu1 %v3416_v59 }
  0xed   : > { %1730 = vmatprep.mubr.bf16.mxu0 %v315_v60  ;;  %2022 = vmatprep.mubr.bf16.mxu1 %v315_v60  ;;  %v530_v58 = vshrl.u32 %v529_v57, 7 }
  0xee   : > { %2894 = vmatprep.subr.bf16.mxu0 %v3419_v61  ;;  %2934 = vmatprep.subr.bf16.mxu1 %v3420_v62  ;;  %v527_v61 = vld [vmem:[%s4318_s2] sm:$0xf] }
  0xef   : > { %v531_v59 = vsub.s32 0, %v530_v58  ;;  %v539_v60 = vsub.s32 2, %v530_v58  ;;  %v535_v62 = vsub.s32 1, %v530_v58  ;;  %v543_v63 = vsub.s32 3, %v530_v58 }
  0xf1   : > { %v4238_v0 = vrot.slane %v527_v61, %v531_v59  ;;  %v4240_v1 = vrot.slane %v527_v61, %v539_v60  ;;  %v4242_v2 = vrot.slane %v527_v61, %v535_v62 }
  0xf3   : > { %1731 = vmatmul.mubr.bf16.gmra.mrb[4].mxu0 %v314_v3  ;;  %2023 = vmatmul.mubr.bf16.gmra.mrb[4].mxu1 %v314_v3  ;;  %v4244_v3 = vrot.slane %v527_v61, %v543_v63 }
  0xf4   : > { %1740 = vmatprep.mubr.bf16.mxu0 %v322_v4  ;;  %2032 = vmatprep.mubr.bf16.mxu1 %v322_v4 }
  0xfb   : > { %1741 = vmatmul.mubr.bf16.gmra.mrb[8].mxu0 %v321_v9  ;;  %2033 = vmatmul.mubr.bf16.gmra.mrb[8].mxu1 %v321_v9 }
  0xfc   : > { %1750 = vmatprep.mubr.bf16.mxu0 %v329_v10  ;;  %2042 = vmatprep.mubr.bf16.mxu1 %v329_v10 }
 0x103   : > { %1751 = vmatmul.mubr.bf16.gmra.mrb[12].mxu0 %v328_v13  ;;  %2043 = vmatmul.mubr.bf16.gmra.mrb[12].mxu1 %v328_v13 }
 0x104   : > { %1793 = vmatprep.mubr.bf16.mxu0 %v3494_v14  ;;  %2085 = vmatprep.mubr.bf16.mxu1 %v3494_v14 }
 0x10b   : > { %2851 = vmatmul.mubr.msk.bf16.vlgmr.msra.gmra.mrb[0].mxu0 %vm1529_vm0, %v309_v17  ;;  %2855 = vmatmul.mubr.msk.bf16.vlgmr.msra.gmra.mrb[0].mxu1 %vm1529_vm0, %v309_v17 }
 0x10c   : > { %1803 = vmatprep.mubr.bf16.mxu0 %v3494_v14  ;;  %2095 = vmatprep.mubr.bf16.mxu1 %v3494_v14 }
 0x10d   : > { %2895 = vmatpush3.bf16.msra.mxu0 %v3421_v18  ;;  %2935 = vmatpush3.bf16.msra.mxu1 %v3422_v19 }
 0x10e   : > { %2896 = vmatprep.subr.bf16.mxu0 %v3423_v20  ;;  %2936 = vmatprep.subr.bf16.mxu1 %v3424_v21 }
 0x111   : > { %2897 = vmatpush3.bf16.msra.mxu0 %v3425_v24  ;;  %2937 = vmatpush3.bf16.msra.mxu1 %v3426_v25 }
 0x112   : > { %2898 = vmatprep.subr.bf16.mxu0 %v3427_v26  ;;  %2938 = vmatprep.subr.bf16.mxu1 %v3428_v27 }
 0x113   : > { %2852 = vmatmul.mubr.msk.bf16.gmra.mrb[4].mxu0 %vm1529_vm0, %v316_v28  ;;  %2856 = vmatmul.mubr.msk.bf16.gmra.mrb[4].mxu1 %vm1529_vm0, %v316_v28 }
 0x114   : > { %1813 = vmatprep.mubr.bf16.mxu0 %v3494_v14  ;;  %2105 = vmatprep.mubr.bf16.mxu1 %v3494_v14 }
 0x115   : > { %2899 = vmatpush3.bf16.msra.mxu0 %v3429_v29  ;;  %2939 = vmatpush3.bf16.msra.mxu1 %v3430_v30 }
 0x116   : > { %2900 = vmatprep.subr.bf16.mxu0 %v3431_v31  ;;  %2940 = vmatprep.subr.bf16.mxu1 %v3432_v32 }
 0x119   : > { %2901 = vmatpush3.bf16.msra.mxu0 %v3433_v35  ;;  %2941 = vmatpush3.bf16.msra.mxu1 %v3434_v36 }
 0x11a   : > { %2902 = vmatprep.subr.bf16.mxu0 %v3435_v37  ;;  %2942 = vmatprep.subr.bf16.mxu1 %v3436_v38 }
 0x11b   : > { %2853 = vmatmul.mubr.msk.bf16.gmra.mrb[8].mxu0 %vm1529_vm0, %v323_v39  ;;  %2857 = vmatmul.mubr.msk.bf16.gmra.mrb[8].mxu1 %vm1529_vm0, %v323_v39 }
 0x11c   : > { %1823 = vmatprep.mubr.bf16.mxu0 %v3494_v14  ;;  %2115 = vmatprep.mubr.bf16.mxu1 %v3494_v14 }
 0x11d   : > { %2903 = vmatpush3.bf16.msra.mxu0 %v3437_v40  ;;  %2943 = vmatpush3.bf16.msra.mxu1 %v3438_v41 }
 0x11e   : > { %2904 = vmatprep.subr.bf16.mxu0 %v3439_v42  ;;  %2944 = vmatprep.subr.bf16.mxu1 %v3440_v43 }
 0x121   : > { %2905 = vmatpush3.bf16.msra.mxu0 %v3441_v47  ;;  %2945 = vmatpush3.bf16.msra.mxu1 %v3442_v48 }
 0x122   : > { %2906 = vmatprep.subr.bf16.mxu0 %v3443_v49  ;;  %2946 = vmatprep.subr.bf16.mxu1 %v3444_v50 }
 0x123   : > { %2854 = vmatmul.mubr.msk.bf16.gmra.mrb[12].mxu0 %vm1529_vm0, %v330_v46  ;;  %2858 = vmatmul.mubr.msk.bf16.gmra.mrb[12].mxu1 %vm1529_vm0, %v330_v46 }
 0x125   : > { %2907 = vmatpush3.bf16.msra.mxu0 %v3445_v51  ;;  %2947 = vmatpush3.bf16.msra.mxu1 %v3446_v52 }
 0x126   : > { %2908 = vmatprep.subr.bf16.mxu0 %v3447_v53  ;;  %2948 = vmatprep.subr.bf16.mxu1 %v3448_v54 }
 0x129   : > { %2909 = vmatpush3.bf16.msra.mxu0 %v3449_v55  ;;  %2949 = vmatpush3.bf16.msra.mxu1 %v3450_v56 }
 0x1de   : > { %v1795_v4 = vpop.f32.mrb[0].mxu0  ;;  %v2087_v5 = vpop.f32.mrb[0].mxu1 }
 0x1df   : > { %v2974_v6 = vadd.f32 %v1795_v4, %v4238_v0  ;;  %v2990_v7 = vadd.f32 %v2087_v5, %v4240_v1  ;;  %v1797_v8 = vpop.f32.mrb[1].mxu0  ;;  %v2089_v9 = vpop.f32.mrb[1].mxu1 }
 0x1e0   : > { %v2975_v10 = vadd.f32 %v1797_v8, %v4242_v2  ;;  %v2991_v11 = vadd.f32 %v2089_v9, %v4244_v3  ;;  %v1799_v12 = vpop.f32.mrb[2].mxu0  ;;  %v2091_v13 = vpop.f32.mrb[2].mxu1 }
 0x1e1   : > { %v2976_v14 = vadd.f32 %v1799_v12, %v4238_v0  ;;  %v2992_v15 = vadd.f32 %v2091_v13, %v4240_v1  ;;  %v1801_v16 = vpop.f32.mrb[3].mxu0  ;;  %v2093_v17 = vpop.f32.mrb[3].mxu1  ;;  %v2126_v20 = vmax.f32 %v2974_v6, 0.0  ;;  %v2128_v21 = vmax.f32 %v2990_v7, 0.0 }
 0x1e2   : > { %v2977_v18 = vadd.f32 %v1801_v16, %v4242_v2  ;;  %v2993_v19 = vadd.f32 %v2093_v17, %v4244_v3  ;;  %v2127_v24 = vmax.f32 %v2975_v10, 0.0  ;;  %v2129_v25 = vmax.f32 %v2991_v11, 0.0 }
 0x1e3   : > { %v2130_v22 = vmax.f32 %v2976_v14, 0.0  ;;  %v2132_v23 = vmax.f32 %v2992_v15, 0.0 }
 0x1e4   : > { %v2131_v26 = vmax.f32 %v2977_v18, 0.0  ;;  %v2133_v27 = vmax.f32 %v2993_v19, 0.0 }
 0x1e5   : > { %v2158_v28 = vpack.c.bf16 %v2130_v22, %v2126_v20  ;;  %v2160_v29 = vpack.c.bf16 %v2132_v23, %v2128_v21 }
 0x1e6   : > { %v2159_v30 = vpack.c.bf16 %v2131_v26, %v2127_v24  ;;  %v2161_v31 = vpack.c.bf16 %v2133_v27, %v2129_v25  ;;  %v1805_v32 = vpop.f32.mrb[4].mxu0  ;;  %v2097_v33 = vpop.f32.mrb[4].mxu1 }
 0x1e7   : > { %v2978_v34 = vadd.f32 %v1805_v32, %v4238_v0  ;;  %v2994_v35 = vadd.f32 %v2097_v33, %v4240_v1  ;;  %v1807_v36 = vpop.f32.mrb[5].mxu0  ;;  %v2099_v37 = vpop.f32.mrb[5].mxu1 }
 0x1e8   : > { %v2979_v38 = vadd.f32 %v1807_v36, %v4242_v2  ;;  %v2995_v39 = vadd.f32 %v2099_v37, %v4244_v3  ;;  %v1809_v40 = vpop.f32.mrb[6].mxu0  ;;  %v2101_v41 = vpop.f32.mrb[6].mxu1  ;;  %2469 = vmatprep.mubr.bf16.mxu0 %v2159_v30  ;;  %2534 = vmatprep.mubr.bf16.mxu1 %v2161_v31 }
 0x1e9   : > { %v2980_v42 = vadd.f32 %v1809_v40, %v4238_v0  ;;  %v2996_v43 = vadd.f32 %v2101_v41, %v4240_v1  ;;  %v1811_v44 = vpop.f32.mrb[7].mxu0  ;;  %v2103_v45 = vpop.f32.mrb[7].mxu1  ;;  %2470 = vmatmul.mubr.bf16.vlgmr.msra.gmra.mrb[16].mxu0 %v2158_v28  ;;  %2535 = vmatmul.mubr.bf16.vlgmr.msra.gmra.mrb[16].mxu1 %v2160_v29  ;;  %v2134_v48 = vmax.f32 %v2978_v34, 0.0  ;;  %v2136_v49 = vmax.f32 %v2994_v35, 0.0 }
 0x1ea   : > { %v2981_v46 = vadd.f32 %v1811_v44, %v4242_v2  ;;  %v2997_v47 = vadd.f32 %v2103_v45, %v4244_v3  ;;  %v2135_v52 = vmax.f32 %v2979_v38, 0.0  ;;  %v2137_v53 = vmax.f32 %v2995_v39, 0.0 }
 0x1eb   : > { %v2138_v50 = vmax.f32 %v2980_v42, 0.0  ;;  %v2140_v51 = vmax.f32 %v2996_v43, 0.0 }
 0x1ec   : > { %v2139_v54 = vmax.f32 %v2981_v46, 0.0  ;;  %v2141_v55 = vmax.f32 %v2997_v47, 0.0 }
 0x1ed   : > { %v2162_v56 = vpack.c.bf16 %v2138_v50, %v2134_v48  ;;  %v2164_v57 = vpack.c.bf16 %v2140_v51, %v2136_v49 }
 0x1ee   : > { %v2163_v58 = vpack.c.bf16 %v2139_v54, %v2135_v52  ;;  %v2165_v59 = vpack.c.bf16 %v2141_v55, %v2137_v53  ;;  %v1815_v60 = vpop.f32.mrb[8].mxu0  ;;  %v2107_v61 = vpop.f32.mrb[8].mxu1 }
 0x1ef   : > { %v2982_v62 = vadd.f32 %v1815_v60, %v4238_v0  ;;  %v2998_v63 = vadd.f32 %v2107_v61, %v4240_v1  ;;  %v1817_v4 = vpop.f32.mrb[9].mxu0  ;;  %v2109_v5 = vpop.f32.mrb[9].mxu1 }
 0x1f0   : > { %v2983_v6 = vadd.f32 %v1817_v4, %v4242_v2  ;;  %v2999_v7 = vadd.f32 %v2109_v5, %v4244_v3  ;;  %v1819_v8 = vpop.f32.mrb[10].mxu0  ;;  %v2111_v9 = vpop.f32.mrb[10].mxu1  ;;  %2477 = vmatprep.mubr.bf16.mxu0 %v2163_v58  ;;  %2542 = vmatprep.mubr.bf16.mxu1 %v2165_v59 }
 0x1f1   : > { %v2984_v10 = vadd.f32 %v1819_v8, %v4238_v0  ;;  %v3000_v11 = vadd.f32 %v2111_v9, %v4240_v1  ;;  %v1821_v12 = vpop.f32.mrb[11].mxu0  ;;  %v2113_v13 = vpop.f32.mrb[11].mxu1  ;;  %2478 = vmatmul.mubr.bf16.gmra.mrb[20].mxu0 %v2162_v56  ;;  %2543 = vmatmul.mubr.bf16.gmra.mrb[20].mxu1 %v2164_v57  ;;  %v2142_v16 = vmax.f32 %v2982_v62, 0.0  ;;  %v2144_v17 = vmax.f32 %v2998_v63, 0.0 }
 0x1f2   : > { %v2985_v14 = vadd.f32 %v1821_v12, %v4242_v2  ;;  %v3001_v15 = vadd.f32 %v2113_v13, %v4244_v3  ;;  %v2143_v20 = vmax.f32 %v2983_v6, 0.0  ;;  %v2145_v21 = vmax.f32 %v2999_v7, 0.0 }
 0x1f3   : > { %v2146_v18 = vmax.f32 %v2984_v10, 0.0  ;;  %v2148_v19 = vmax.f32 %v3000_v11, 0.0 }
 0x1f4   : > { %v2147_v22 = vmax.f32 %v2985_v14, 0.0  ;;  %v2149_v23 = vmax.f32 %v3001_v15, 0.0 }
 0x1f5   : > { %v2166_v24 = vpack.c.bf16 %v2146_v18, %v2142_v16  ;;  %v2168_v25 = vpack.c.bf16 %v2148_v19, %v2144_v17 }
 0x1f6   : > { %v2167_v26 = vpack.c.bf16 %v2147_v22, %v2143_v20  ;;  %v2169_v27 = vpack.c.bf16 %v2149_v23, %v2145_v21  ;;  %v1825_v28 = vpop.f32.mrb[12].mxu0  ;;  %v2117_v29 = vpop.f32.mrb[12].mxu1 }
 0x1f7   : > { %v2986_v30 = vadd.f32 %v1825_v28, %v4238_v0  ;;  %v3002_v31 = vadd.f32 %v2117_v29, %v4240_v1  ;;  %v1827_v32 = vpop.f32.mrb[13].mxu0  ;;  %v2119_v33 = vpop.f32.mrb[13].mxu1 }
 0x1f8   : > { %v2987_v34 = vadd.f32 %v1827_v32, %v4242_v2  ;;  %v3003_v35 = vadd.f32 %v2119_v33, %v4244_v3  ;;  %v1829_v36 = vpop.f32.mrb[14].mxu0  ;;  %v2121_v37 = vpop.f32.mrb[14].mxu1  ;;  %2485 = vmatprep.mubr.bf16.mxu0 %v2167_v26  ;;  %2550 = vmatprep.mubr.bf16.mxu1 %v2169_v27 }
 0x1f9   : > { %v2988_v38 = vadd.f32 %v1829_v36, %v4238_v0  ;;  %v3004_v39 = vadd.f32 %v2121_v37, %v4240_v1  ;;  %v1831_v40 = vpop.f32.mrb[15].mxu0  ;;  %v2123_v41 = vpop.f32.mrb[15].mxu1  ;;  %2486 = vmatmul.mubr.bf16.gmra.mrb[24].mxu0 %v2166_v24  ;;  %2551 = vmatmul.mubr.bf16.gmra.mrb[24].mxu1 %v2168_v25  ;;  %v2150_v44 = vmax.f32 %v2986_v30, 0.0  ;;  %v2152_v45 = vmax.f32 %v3002_v31, 0.0 }
 0x1fa   : > { %v2989_v42 = vadd.f32 %v1831_v40, %v4242_v2  ;;  %v3005_v43 = vadd.f32 %v2123_v41, %v4244_v3  ;;  %v2151_v48 = vmax.f32 %v2987_v34, 0.0  ;;  %v2153_v49 = vmax.f32 %v3003_v35, 0.0  ;;  %v4281_v3 = vld [vmem:[%s4320_s4] ss:$0 sm:$0xff] }
 0x1fb   : > { %v2154_v46 = vmax.f32 %v2988_v38, 0.0  ;;  %v2156_v47 = vmax.f32 %v3004_v39, 0.0 }
 0x1fc   : > { %v2155_v50 = vmax.f32 %v2989_v42, 0.0  ;;  %v2157_v51 = vmax.f32 %v3005_v43, 0.0 }
 0x1fd   : > { %v2170_v0 = vpack.c.bf16 %v2154_v46, %v2150_v44  ;;  %v2172_v52 = vpack.c.bf16 %v2156_v47, %v2152_v45 }
 0x1fe   : > { %v2171_v1 = vpack.c.bf16 %v2155_v50, %v2151_v48  ;;  %v2173_v53 = vpack.c.bf16 %v2157_v51, %v2153_v49 }
 0x200   : > { %2493 = vmatprep.mubr.bf16.mxu0 %v2171_v1  ;;  %2558 = vmatprep.mubr.bf16.mxu1 %v2173_v53 }
 0x201   : > { %2494 = vmatmul.mubr.bf16.gmra.mrb[28].mxu0 %v2170_v0  ;;  %2559 = vmatmul.mubr.bf16.gmra.mrb[28].mxu1 %v2172_v52 }
 0x2bc   : > { %v2910_v2 = vpop.f32.mrb[16].mxu0  ;;  %v2950_v54 = vpop.f32.mrb[16].mxu1 }
 0x2bd   : > { %v2911_v55 = vpop.f32.mrb[17].mxu0  ;;  %v2951_v56 = vpop.f32.mrb[17].mxu1 }
 0x2be   : > { %v2912_v57 = vadd.f32 %v2911_v55, %v2910_v2  ;;  %v2952_v58 = vadd.f32 %v2951_v56, %v2950_v54  ;;  %v2913_v59 = vpop.f32.mrb[18].mxu0  ;;  %v2953_v60 = vpop.f32.mrb[18].mxu1 }
 0x2bf   : > { %v2914_v61 = vpop.f32.mrb[19].mxu0  ;;  %v2954_v62 = vpop.f32.mrb[19].mxu1 }
 0x2c0   : > { %v2472_v63 = vadd.f32 %v2912_v57, %v4281_v3  ;;  %v2915_v4 = vadd.f32 %v2914_v61, %v2913_v59  ;;  %v2955_v5 = vadd.f32 %v2954_v62, %v2953_v60 }
 0x2c2   : > { %v2537_v6 = vadd.f32 %v2952_v58, %v2472_v63  ;;  %v2475_v7 = vadd.f32 %v2915_v4, %v4281_v3 }
 0x2c4   : > { %2568 = vst.msk [vmem:[%s4288_s14] sm:$0xff] %vm2567_vm1, %v2537_v6  ;;  %v2540_v8 = vadd.f32 %v2955_v5, %v2475_v7  ;;  %v2916_v9 = vpop.f32.mrb[20].mxu0  ;;  %v2956_v10 = vpop.f32.mrb[20].mxu1 }
 0x2c5   : > { %v2917_v11 = vpop.f32.mrb[21].mxu0  ;;  %v2957_v12 = vpop.f32.mrb[21].mxu1 }
 0x2c6   : > { %2569 = vst.msk [vmem:[%s4288_s14 + $0x8] sm:$0xff] %vm2567_vm1, %v2540_v8  ;;  %v2918_v13 = vadd.f32 %v2917_v11, %v2916_v9  ;;  %v2958_v14 = vadd.f32 %v2957_v12, %v2956_v10  ;;  %v2919_v15 = vpop.f32.mrb[22].mxu0  ;;  %v2959_v16 = vpop.f32.mrb[22].mxu1 }
 0x2c7   : > { %v2920_v17 = vpop.f32.mrb[23].mxu0  ;;  %v2960_v18 = vpop.f32.mrb[23].mxu1 }
 0x2c8   : > { %v2480_v19 = vadd.f32 %v2918_v13, %v4281_v3  ;;  %v2921_v20 = vadd.f32 %v2920_v17, %v2919_v15  ;;  %v2961_v21 = vadd.f32 %v2960_v18, %v2959_v16 }
 0x2ca   : > { %v2545_v22 = vadd.f32 %v2958_v14, %v2480_v19  ;;  %v2483_v23 = vadd.f32 %v2921_v20, %v4281_v3 }
 0x2cc   : > { %2570 = vst.msk [vmem:[%s4288_s14 + $0x10] sm:$0xff] %vm2567_vm1, %v2545_v22  ;;  %v2548_v24 = vadd.f32 %v2961_v21, %v2483_v23  ;;  %v2922_v25 = vpop.f32.mrb[24].mxu0  ;;  %v2962_v26 = vpop.f32.mrb[24].mxu1 }
 0x2cd   : > { %v2923_v27 = vpop.f32.mrb[25].mxu0  ;;  %v2963_v28 = vpop.f32.mrb[25].mxu1 }
 0x2ce   : > { %2571 = vst.msk [vmem:[%s4288_s14 + $0x18] sm:$0xff] %vm2567_vm1, %v2548_v24  ;;  %v2924_v29 = vadd.f32 %v2923_v27, %v2922_v25  ;;  %v2964_v30 = vadd.f32 %v2963_v28, %v2962_v26  ;;  %v2925_v31 = vpop.f32.mrb[26].mxu0  ;;  %v2965_v32 = vpop.f32.mrb[26].mxu1 }
 0x2cf   : > { %v2926_v33 = vpop.f32.mrb[27].mxu0  ;;  %v2966_v34 = vpop.f32.mrb[27].mxu1 }
 0x2d0   : > { %v2488_v35 = vadd.f32 %v2924_v29, %v4281_v3  ;;  %v2927_v36 = vadd.f32 %v2926_v33, %v2925_v31  ;;  %v2967_v37 = vadd.f32 %v2966_v34, %v2965_v32 }
 0x2d2   : > { %v2553_v38 = vadd.f32 %v2964_v30, %v2488_v35  ;;  %v2491_v39 = vadd.f32 %v2927_v36, %v4281_v3 }
 0x2d4   : > { %2572 = vst.msk [vmem:[%s4288_s14 + $0x20] sm:$0xff] %vm2567_vm1, %v2553_v38  ;;  %v2556_v40 = vadd.f32 %v2967_v37, %v2491_v39  ;;  %v2928_v41 = vpop.f32.mrb[28].mxu0  ;;  %v2968_v42 = vpop.f32.mrb[28].mxu1 }
 0x2d5   : > { %v2929_v43 = vpop.f32.mrb[29].mxu0  ;;  %v2969_v44 = vpop.f32.mrb[29].mxu1 }
 0x2d6   : > { %2573 = vst.msk [vmem:[%s4288_s14 + $0x28] sm:$0xff] %vm2567_vm1, %v2556_v40  ;;  %v2930_v45 = vadd.f32 %v2929_v43, %v2928_v41  ;;  %v2970_v46 = vadd.f32 %v2969_v44, %v2968_v42  ;;  %v2931_v47 = vpop.f32.mrb[30].mxu0  ;;  %v2971_v48 = vpop.f32.mrb[30].mxu1 }
 0x2d7   : > { %v2932_v49 = vpop.f32.mrb[31].mxu0  ;;  %v2972_v50 = vpop.f32.mrb[31].mxu1 }
 0x2d8   : > { %v2496_v51 = vadd.f32 %v2930_v45, %v4281_v3  ;;  %v2933_v0 = vadd.f32 %v2932_v49, %v2931_v47  ;;  %v2973_v52 = vadd.f32 %v2972_v50, %v2971_v48 }
 0x2da   : > { %v2561_v1 = vadd.f32 %v2970_v46, %v2496_v51  ;;  %v2499_v53 = vadd.f32 %v2933_v0, %v4281_v3 }
 0x2dc   : > { %2574 = vst.msk [vmem:[%s4288_s14 + $0x30] sm:$0xff] %vm2567_vm1, %v2561_v1  ;;  %v2564_v2 = vadd.f32 %v2973_v52, %v2499_v53 }
 0x2de   : > { %2575 = vst.msk [vmem:[%s4288_s14 + $0x38] sm:$0xff] %vm2567_vm1, %v2564_v2 }
 0x2df PF: > { %s16_s18 = sadd.s32 1, %s3489_s18  }
 0x2e0   : > { %p13_p3 = scmp.ge.s32.totalorder %s16_s18, 4  }
 0x2e2   :  { %15 = sbr.rel (!%p13_p3) target bundleno = 1 (0x1), region = 75 }
 0x2e9   :  { %2598 = vsyncpa [#allocation3], 1 }
 0x2ea   :  { %2600 = vsyncpa [#allocation3 + $0x1], 1 }

</bundles_post_ra>
